<compile_context>
chip_gen: v7x
topology: tpu7x:2x2x1
jax: 0.10.0
libtpu: 0.0.40
codegen_flags: <defaults>
</compile_context>

<pallas_src>
import jax
import jax.numpy as jnp
from jax import lax
from jax.experimental import pallas as pl
from jax.experimental.pallas import tpu as pltpu

# ---------------- model hyper-parameters (small, synthetic config) ----------
VOCAB = 256
HIDDEN = 128
NUM_LAYERS = 2
NUM_HEADS = 4
HEAD_DIM = HIDDEN // NUM_HEADS          # 32
INTERMEDIATE = 256
SEQ = 8
EPS = 1e-6
ROPE_THETA = 10000.0
LOGIT_SCALE = 1.0                       # config.logit_scale default
MASK_VALUE = -1e30                      # finite mask (robust to padded rows)


# ---------------------------- Pallas kernel ---------------------------------
def fused_forward_kernel(x_ref, cos_ref, sina_ref, sinb_ref, mask_ref, fln_ref,
                         lmw_ref,
                         wq_ref, wk_ref, wv_ref, wo_ref,
                         wg_ref, wu_ref, wd_ref,
                         hid_ref, logits_ref, h_scr):
    """Whole decoder stack + lm_head; grid axis = layer index (VMEM carry)."""
    layer = pl.program_id(0)

    @pl.when(layer == 0)
    def _():
        h_scr[...] = x_ref[...]

    x = h_scr[...]                                  # (S, H) f32, resident
    cos = cos_ref[...]                              # (S, H) f32
    sina = sina_ref[...]                            # (S, H) f32 (-sin, 1st half)
    sinb = sinb_ref[...]                            # (S, H) f32 (+sin, 2nd half)
    S = x.shape[0]

    def rmsnorm(v):                                 # scales folded into weights
        var = jnp.mean(v * v, axis=-1, keepdims=True)
        return v * lax.rsqrt(var + EPS)

    def rope(t):
        # rotate_half(t) * sin == roll(t, -half)*sinA + roll(t, +half)*sinB
        # signs and the first/second-half lane selection are folded into the
        # precomputed sinA/sinB tables; both rolls are full-128-lane XLU
        # rotations (no MXU, no lane concatenates).
        return (t * cos
                + pltpu.roll(t, HIDDEN - HEAD_DIM // 2, axis=1) * sina
                + pltpu.roll(t, HEAD_DIM // 2, axis=1) * sinb)

    # ---- attention block (pre-norm) ----
    hb = rmsnorm(x).astype(jnp.bfloat16)
    q = jnp.dot(hb, wq_ref[...], preferred_element_type=jnp.float32)
    k = jnp.dot(hb, wk_ref[...], preferred_element_type=jnp.float32)
    v = jnp.dot(hb, wv_ref[...], preferred_element_type=jnp.float32)

    q = rope(q)
    k = rope(k)

    # heads batched: (NUM_HEADS, S, HEAD_DIM)
    q4 = q.reshape(S, NUM_HEADS, HEAD_DIM).transpose(1, 0, 2).astype(jnp.bfloat16)
    k4 = k.reshape(S, NUM_HEADS, HEAD_DIM).transpose(1, 0, 2).astype(jnp.bfloat16)
    v4 = v.reshape(S, NUM_HEADS, HEAD_DIM).transpose(1, 0, 2).astype(jnp.bfloat16)

    scale = HEAD_DIM ** -0.5
    s = jnp.einsum('hqd,hkd->hqk', q4, k4,
                   preferred_element_type=jnp.float32) * scale
    s = s + mask_ref[...][None, :, :]               # hoisted additive causal mask

    m = jnp.max(s, axis=-1, keepdims=True)
    p = jnp.exp(s - m)
    denom = jnp.sum(p, axis=-1, keepdims=True)
    p = p * pl.reciprocal(denom, approx=True)

    o = jnp.einsum('hqk,hkd->hqd', p.astype(jnp.bfloat16), v4,
                   preferred_element_type=jnp.float32)
    attn = o.transpose(1, 0, 2).reshape(S, HIDDEN).astype(jnp.bfloat16)
    x = x + jnp.dot(attn, wo_ref[...], preferred_element_type=jnp.float32)

    # ---- MLP block (SwiGLU, pre-norm) ----
    h2 = rmsnorm(x).astype(jnp.bfloat16)
    gate = jnp.dot(h2, wg_ref[...], preferred_element_type=jnp.float32)
    up = jnp.dot(h2, wu_ref[...], preferred_element_type=jnp.float32)
    act = (gate * jax.nn.sigmoid(gate) * up).astype(jnp.bfloat16)
    x = x + jnp.dot(act, wd_ref[...], preferred_element_type=jnp.float32)

    h_scr[...] = x

    # ---- final RMSNorm + fused lm_head (tied embedding), last layer only ----
    @pl.when(layer == pl.num_programs(0) - 1)
    def _():
        xf = h_scr[...]
        var = jnp.mean(xf * xf, axis=-1, keepdims=True)
        hf = xf * lax.rsqrt(var + EPS) * fln_ref[...]
        hid_ref[...] = hf
        logits = lax.dot_general(
            hf.astype(jnp.bfloat16), lmw_ref[...],          # (V, H) bf16
            dimension_numbers=(((1,), (1,)), ((), ())),
            preferred_element_type=jnp.float32)
        logits_ref[...] = logits * LOGIT_SCALE


# ---------------------------- pallas_call glue -------------------------------
def forward_and_logits(hidden, stacked, cos, sina, sinb, mask, final_ln,
                       lm_head_w):
    """Mirrors TransformersForCausalLM forward + compute_logits.

    Returns (hidden_states [S, H] f32, logits [S, V] f32) from ONE pallas_call.
    """
    S = hidden.shape[0]
    V = lm_head_w.shape[0]

    layer_hh = pl.BlockSpec((None, HIDDEN, HIDDEN), lambda l: (l, 0, 0))
    layer_hi = pl.BlockSpec((None, HIDDEN, INTERMEDIATE), lambda l: (l, 0, 0))
    layer_ih = pl.BlockSpec((None, INTERMEDIATE, HIDDEN), lambda l: (l, 0, 0))

    def const2(shape):
        return pl.BlockSpec(shape, lambda l: (0, 0))

    return pl.pallas_call(
        fused_forward_kernel,
        out_shape=(jax.ShapeDtypeStruct((S, HIDDEN), jnp.float32),
                   jax.ShapeDtypeStruct((S, V), jnp.float32)),
        grid=(NUM_LAYERS,),
        in_specs=[
            const2((S, HIDDEN)),          # x (resident via carry)
            const2((S, HIDDEN)),          # cos
            const2((S, HIDDEN)),          # sinA (signed, first-half lanes)
            const2((S, HIDDEN)),          # sinB (second-half lanes)
            const2((S, S)),               # additive causal mask (hoisted)
            const2((1, HIDDEN)),          # final RMSNorm weight
            const2((V, HIDDEN)),          # lm_head (tied embedding) bf16
            layer_hh, layer_hh, layer_hh, layer_hh,      # q k v o
            layer_hi, layer_hi, layer_ih,                # gate up down
        ],
        out_specs=(const2((S, HIDDEN)),   # hidden_states
                   const2((S, V))),       # logits (256-lane dense block)
        scratch_shapes=[pltpu.VMEM((S, HIDDEN), jnp.float32)],
        compiler_params=pltpu.CompilerParams(
            dimension_semantics=("arbitrary",),
            vmem_limit_bytes=48 * 1024 * 1024),
    )(hidden, cos, sina, sinb, mask, final_ln, lm_head_w,
      stacked["wq"], stacked["wk"], stacked["wv"], stacked["wo"],
      stacked["wg"], stacked["wu"], stacked["wd"])


# ---------------------------- parameters -------------------------------------
def init_params(key):
    def nrm(k, shape, scale=0.02):
        return (scale * jax.random.normal(k, shape)).astype(jnp.float32)

    keys = jax.random.split(key, 2 + NUM_LAYERS * 8)
    params = {
        "embed": nrm(keys[0], (VOCAB, HIDDEN)),
        "final_ln": jnp.ones((1, HIDDEN), jnp.float32),
        "layers": [],
    }
    for li in range(NUM_LAYERS):
        k = keys[2 + li * 8: 2 + (li + 1) * 8]
        params["layers"].append({
            "ln1": jnp.ones((1, HIDDEN), jnp.float32),
            "wq": nrm(k[0], (HIDDEN, HIDDEN)),
            "wk": nrm(k[1], (HIDDEN, HIDDEN)),
            "wv": nrm(k[2], (HIDDEN, HIDDEN)),
            "wo": nrm(k[3], (HIDDEN, HIDDEN)),
            "ln2": jnp.ones((1, HIDDEN), jnp.float32),
            "wg": nrm(k[4], (HIDDEN, INTERMEDIATE)),
            "wu": nrm(k[5], (HIDDEN, INTERMEDIATE)),
            "wd": nrm(k[6], (INTERMEDIATE, HIDDEN)),
        })
    return params


def prepare_weights(params):
    """Stack per-layer weights (leading layer axis), fold RMSNorm scales into
    the following projections (exact), and cast matmul weights to bf16."""
    def stack(name, fold=None):
        ws = []
        for p in params["layers"]:
            w = p[name]
            if fold is not None:
                w = p[fold][0][:, None] * w   # (x*rsqrt*ln) @ W == (x*rsqrt) @ (ln[:,None]*W)
            ws.append(w.astype(jnp.bfloat16))
        return jnp.stack(ws, axis=0)

    return {
        "wq": stack("wq", fold="ln1"),
        "wk": stack("wk", fold="ln1"),
        "wv": stack("wv", fold="ln1"),
        "wo": stack("wo"),
        "wg": stack("wg", fold="ln2"),
        "wu": stack("wu", fold="ln2"),
        "wd": stack("wd"),
    }


def rope_tables(positions):
    """cos / signed-half-selected sin tables, tiled across heads to (S, HIDDEN).

    rotate_half(q) * sin == roll(q, -HEAD_DIM//2)*sinA + roll(q, +HEAD_DIM//2)*sinB
    with sinA = -sin on each head's first half (0 elsewhere),
         sinB = +sin on each head's second half (0 elsewhere).
    """
    half = HEAD_DIM // 2
    inv_freq = 1.0 / (
        ROPE_THETA ** (jnp.arange(0, HEAD_DIM, 2, dtype=jnp.float32) / HEAD_DIM)
    )
    freqs = positions.astype(jnp.float32)[:, None] * inv_freq[None, :]  # (S, half)
    emb = jnp.concatenate([freqs, freqs], axis=-1)                      # (S, HEAD_DIM)
    cos = jnp.tile(jnp.cos(emb), (1, NUM_HEADS))                        # (S, HIDDEN)
    sin = jnp.tile(jnp.sin(emb), (1, NUM_HEADS))                        # (S, HIDDEN)
    d_local = jnp.arange(HIDDEN) % HEAD_DIM
    first_half = (d_local < half)[None, :]
    sina = jnp.where(first_half, -sin, 0.0).astype(jnp.float32)
    sinb = jnp.where(first_half, 0.0, sin).astype(jnp.float32)
    return cos.astype(jnp.float32), sina, sinb


def causal_mask(S):
    """Additive (S, S) f32 mask: 0 where attendable, MASK_VALUE elsewhere."""
    row = jnp.arange(S)[:, None]
    col = jnp.arange(S)[None, :]
    return jnp.where(col <= row, 0.0, MASK_VALUE).astype(jnp.float32)


if __name__ == "__main__":
    key = jax.random.PRNGKey(0)
    params = init_params(key)
    stacked = prepare_weights(params)

    ids_key, _ = jax.random.split(key)
    input_ids = jax.random.randint(ids_key, (SEQ,), 0, VOCAB, dtype=jnp.int32)
    positions = jnp.arange(SEQ, dtype=jnp.int32)

    # hoisted constants: rope tables, causal mask, tied lm_head in bf16
    cos, sina, sinb = rope_tables(positions)
    mask = causal_mask(SEQ)
    lm_head_w = params["embed"].astype(jnp.bfloat16)        # tied embedding (V, H)

    # input embedding lookup (VocabParallelEmbedding) — glue gather in JAX
    hidden = params["embed"][input_ids]                      # (S, H) f32

    hidden_states, logits = forward_and_logits(
        hidden, stacked, cos, sina, sinb, mask, params["final_ln"], lm_head_w)
    hidden_states = jax.block_until_ready(hidden_states)
    logits = jax.block_until_ready(logits)

    assert hidden_states.shape == (SEQ, HIDDEN)
    assert logits.shape == (SEQ, VOCAB)
    assert bool(jnp.all(jnp.isfinite(hidden_states)))
    assert bool(jnp.all(jnp.isfinite(logits)))
    print("KERNEL_OK")
</pallas_src>

<mosaic_0001>
module attributes {stable_mosaic.version = 11 : i64} {
  func.func @fused_forward_kernel(%arg0: i32, %arg1: memref<8x128xf32, #tpu.memory_space<vmem>>, %arg2: memref<8x128xf32, #tpu.memory_space<vmem>>, %arg3: memref<8x128xf32, #tpu.memory_space<vmem>>, %arg4: memref<8x128xf32, #tpu.memory_space<vmem>>, %arg5: memref<8x8xf32, #tpu.memory_space<vmem>>, %arg6: memref<1x128xf32, #tpu.memory_space<vmem>>, %arg7: memref<256x128xbf16, #tpu.memory_space<vmem>>, %arg8: memref<1x128x128xbf16, #tpu.memory_space<vmem>>, %arg9: memref<1x128x128xbf16, #tpu.memory_space<vmem>>, %arg10: memref<1x128x128xbf16, #tpu.memory_space<vmem>>, %arg11: memref<1x128x128xbf16, #tpu.memory_space<vmem>>, %arg12: memref<1x128x256xbf16, #tpu.memory_space<vmem>>, %arg13: memref<1x128x256xbf16, #tpu.memory_space<vmem>>, %arg14: memref<1x256x128xbf16, #tpu.memory_space<vmem>>, %arg15: memref<8x128xf32, #tpu.memory_space<vmem>>, %arg16: memref<8x256xf32, #tpu.memory_space<vmem>>, %arg17: memref<8x128xf32, #tpu.memory_space<vmem>>) attributes {dimension_semantics = [#tpu.dimension_semantics<arbitrary>], iteration_bounds = array<i64: 2>, scalar_prefetch = 0 : i64, scratch_operands = 1 : i64, tpu.core_type = #tpu.core_type<tc>, window_params = [{pipeline_mode = #tpu.pipeline_mode<synchronous>, transform_indices = @transform_0, window_bounds = array<i64: 8, 128>}, {pipeline_mode = #tpu.pipeline_mode<synchronous>, transform_indices = @transform_1, window_bounds = array<i64: 8, 128>}, {pipeline_mode = #tpu.pipeline_mode<synchronous>, transform_indices = @transform_2, window_bounds = array<i64: 8, 128>}, {pipeline_mode = #tpu.pipeline_mode<synchronous>, transform_indices = @transform_3, window_bounds = array<i64: 8, 128>}, {pipeline_mode = #tpu.pipeline_mode<synchronous>, transform_indices = @transform_4, window_bounds = array<i64: 8, 8>}, {pipeline_mode = #tpu.pipeline_mode<synchronous>, transform_indices = @transform_5, window_bounds = array<i64: 1, 128>}, {pipeline_mode = #tpu.pipeline_mode<synchronous>, transform_indices = @transform_6, window_bounds = array<i64: 256, 128>}, {transform_indices = @transform_7, window_bounds = array<i64: 1, 128, 128>}, {transform_indices = @transform_8, window_bounds = array<i64: 1, 128, 128>}, {transform_indices = @transform_9, window_bounds = array<i64: 1, 128, 128>}, {transform_indices = @transform_10, window_bounds = array<i64: 1, 128, 128>}, {transform_indices = @transform_11, window_bounds = array<i64: 1, 128, 256>}, {transform_indices = @transform_12, window_bounds = array<i64: 1, 128, 256>}, {transform_indices = @transform_13, window_bounds = array<i64: 1, 256, 128>}, {pipeline_mode = #tpu.pipeline_mode<synchronous>, transform_indices = @transform_14, window_bounds = array<i64: 8, 128>}, {pipeline_mode = #tpu.pipeline_mode<synchronous>, transform_indices = @transform_15, window_bounds = array<i64: 8, 256>}]} {
    %c0_i32 = arith.constant 0 : i32
    %0 = arith.cmpi eq, %arg0, %c0_i32 : i32
    %1 = arith.extui %0 : i1 to i32
    %c0_i32_0 = arith.constant 0 : i32
    %2 = arith.cmpi ne, %1, %c0_i32_0 : i32
    scf.if %2 {
      %c0_54 = arith.constant 0 : index
      %c0_55 = arith.constant 0 : index
      %109 = vector.load %arg1[%c0_54, %c0_55] : memref<8x128xf32, #tpu.memory_space<vmem>>, vector<8x128xf32>
      %c0_56 = arith.constant 0 : index
      %c0_57 = arith.constant 0 : index
      %110 = vector.load %arg17[%c0_56, %c0_57] : memref<8x128xf32, #tpu.memory_space<vmem>>, vector<8x128xf32>
      tpu.vector_store %arg17[%c0_56, %c0_57], %109 {strides = array<i32>} : memref<8x128xf32, #tpu.memory_space<vmem>>, vector<8x128xf32>,
    } else {
    }
    %c0 = arith.constant 0 : index
    %c0_1 = arith.constant 0 : index
    %3 = vector.load %arg17[%c0, %c0_1] : memref<8x128xf32, #tpu.memory_space<vmem>>, vector<8x128xf32>
    %c0_2 = arith.constant 0 : index
    %c0_3 = arith.constant 0 : index
    %4 = vector.load %arg2[%c0_2, %c0_3] : memref<8x128xf32, #tpu.memory_space<vmem>>, vector<8x128xf32>
    %c0_4 = arith.constant 0 : index
    %c0_5 = arith.constant 0 : index
    %5 = vector.load %arg3[%c0_4, %c0_5] : memref<8x128xf32, #tpu.memory_space<vmem>>, vector<8x128xf32>
    %c0_6 = arith.constant 0 : index
    %c0_7 = arith.constant 0 : index
    %6 = vector.load %arg4[%c0_6, %c0_7] : memref<8x128xf32, #tpu.memory_space<vmem>>, vector<8x128xf32>
    %7 = arith.mulf %3, %3 : vector<8x128xf32>
    %cst = arith.constant dense<0.000000e+00> : vector<8xf32>
    %8 = vector.multi_reduction <add>, %7, %cst [1] : vector<8x128xf32> to vector<8xf32>
    %9 = vector.shape_cast %8 : vector<8xf32> to vector<8x1xf32>
    %cst_8 = arith.constant 1.280000e+02 : f32
    %10 = vector.broadcast %cst_8 : f32 to vector<8x1xf32>
    %11 = arith.divf %9, %10 : vector<8x1xf32>
    %cst_9 = arith.constant 9.99999997E-7 : f32
    %12 = vector.broadcast %cst_9 : f32 to vector<8x1xf32>
    %13 = arith.addf %11, %12 : vector<8x1xf32>
    %14 = math.rsqrt %13 : vector<8x1xf32>
    %15 = vector.broadcast %14 : vector<8x1xf32> to vector<8x128xf32>
    %16 = arith.mulf %3, %15 : vector<8x128xf32>
    %17 = arith.truncf %16 : vector<8x128xf32> to vector<8x128xbf16>
    %c0_10 = arith.constant 0 : index
    %c0_11 = arith.constant 0 : index
    %c0_12 = arith.constant 0 : index
    %18 = vector.load %arg8[%c0_10, %c0_11, %c0_12] : memref<1x128x128xbf16, #tpu.memory_space<vmem>>, vector<1x128x128xbf16>
    %19 = vector.shape_cast %18 : vector<1x128x128xbf16> to vector<128x128xbf16>
    %cst_13 = arith.constant dense<0.000000e+00> : vector<8x128xf32>
    %20 = tpu.matmul %17, %19, %cst_13 {dimension_numbers = #tpu.dot_dimension_numbers<[1], [0], [0], [1], [0, 0, 1, 1], [], []>} : vector<8x128xbf16>, vector<128x128xbf16>, vector<8x128xf32> -> vector<8x128xf32>
    %c0_14 = arith.constant 0 : index
    %c0_15 = arith.constant 0 : index
    %c0_16 = arith.constant 0 : index
    %21 = vector.load %arg9[%c0_14, %c0_15, %c0_16] : memref<1x128x128xbf16, #tpu.memory_space<vmem>>, vector<1x128x128xbf16>
    %22 = vector.shape_cast %21 : vector<1x128x128xbf16> to vector<128x128xbf16>
    %cst_17 = arith.constant dense<0.000000e+00> : vector<8x128xf32>
    %23 = tpu.matmul %17, %22, %cst_17 {dimension_numbers = #tpu.dot_dimension_numbers<[1], [0], [0], [1], [0, 0, 1, 1], [], []>} : vector<8x128xbf16>, vector<128x128xbf16>, vector<8x128xf32> -> vector<8x128xf32>
    %c0_18 = arith.constant 0 : index
    %c0_19 = arith.constant 0 : index
    %c0_20 = arith.constant 0 : index
    %24 = vector.load %arg10[%c0_18, %c0_19, %c0_20] : memref<1x128x128xbf16, #tpu.memory_space<vmem>>, vector<1x128x128xbf16>
    %25 = vector.shape_cast %24 : vector<1x128x128xbf16> to vector<128x128xbf16>
    %cst_21 = arith.constant dense<0.000000e+00> : vector<8x128xf32>
    %26 = tpu.matmul %17, %25, %cst_21 {dimension_numbers = #tpu.dot_dimension_numbers<[1], [0], [0], [1], [0, 0, 1, 1], [], []>} : vector<8x128xbf16>, vector<128x128xbf16>, vector<8x128xf32> -> vector<8x128xf32>
    %27 = arith.mulf %20, %4 : vector<8x128xf32>
    %c112_i32 = arith.constant 112 : i32
    %28 = tpu.dynamic_rotate %20 by %c112_i32 dim 1 : vector<8x128xf32>, i32 -> vector<8x128xf32>
    %29 = arith.mulf %28, %5 : vector<8x128xf32>
    %30 = arith.addf %27, %29 : vector<8x128xf32>
    %c16_i32 = arith.constant 16 : i32
    %31 = tpu.dynamic_rotate %20 by %c16_i32 dim 1 : vector<8x128xf32>, i32 -> vector<8x128xf32>
    %32 = arith.mulf %31, %6 : vector<8x128xf32>
    %33 = arith.addf %30, %32 : vector<8x128xf32>
    %34 = arith.mulf %23, %4 : vector<8x128xf32>
    %c112_i32_22 = arith.constant 112 : i32
    %35 = tpu.dynamic_rotate %23 by %c112_i32_22 dim 1 : vector<8x128xf32>, i32 -> vector<8x128xf32>
    %36 = arith.mulf %35, %5 : vector<8x128xf32>
    %37 = arith.addf %34, %36 : vector<8x128xf32>
    %c16_i32_23 = arith.constant 16 : i32
    %38 = tpu.dynamic_rotate %23 by %c16_i32_23 dim 1 : vector<8x128xf32>, i32 -> vector<8x128xf32>
    %39 = arith.mulf %38, %6 : vector<8x128xf32>
    %40 = arith.addf %37, %39 : vector<8x128xf32>
    %41 = vector.shape_cast %33 : vector<8x128xf32> to vector<8x4x32xf32>
    %42 = tpu.transpose %41, [1, 0, 2] : vector<8x4x32xf32> -> vector<4x8x32xf32>
    %43 = arith.truncf %42 : vector<4x8x32xf32> to vector<4x8x32xbf16>
    %44 = vector.shape_cast %40 : vector<8x128xf32> to vector<8x4x32xf32>
    %45 = tpu.transpose %44, [1, 0, 2] : vector<8x4x32xf32> -> vector<4x8x32xf32>
    %46 = arith.truncf %45 : vector<4x8x32xf32> to vector<4x8x32xbf16>
    %47 = vector.shape_cast %26 : vector<8x128xf32> to vector<8x4x32xf32>
    %48 = tpu.transpose %47, [1, 0, 2] : vector<8x4x32xf32> -> vector<4x8x32xf32>
    %49 = arith.truncf %48 : vector<4x8x32xf32> to vector<4x8x32xbf16>
    "tpu.trace_start"() <{level = 10 : i32, message = "hqd,hkd->hqk"}> : () -> ()
    %cst_24 = arith.constant dense<0.000000e+00> : vector<4x8x8xf32>
    %50 = tpu.matmul %43, %46, %cst_24 {dimension_numbers = #tpu.dot_dimension_numbers<[2], [2], [1], [1], [0, 0, 0, 1, 1, 1], [0], [0]>} : vector<4x8x32xbf16>, vector<4x8x32xbf16>, vector<4x8x8xf32> -> vector<4x8x8xf32>
    "tpu.trace_stop"() : () -> ()
    %cst_25 = arith.constant 0.176776692 : f32
    %51 = vector.broadcast %cst_25 : f32 to vector<4x8x8xf32>
    %52 = arith.mulf %50, %51 : vector<4x8x8xf32>
    %c0_26 = arith.constant 0 : index
    %c0_27 = arith.constant 0 : index
    %53 = vector.load %arg5[%c0_26, %c0_27] : memref<8x8xf32, #tpu.memory_space<vmem>>, vector<8x8xf32>
    %54 = vector.shape_cast %53 : vector<8x8xf32> to vector<1x8x8xf32>
    %55 = vector.broadcast %54 : vector<1x8x8xf32> to vector<4x8x8xf32>
    %56 = arith.addf %52, %55 : vector<4x8x8xf32>
    %cst_28 = arith.constant dense<0xFF800000> : vector<4x8xf32>
    %57 = vector.multi_reduction <maximumf>, %56, %cst_28 [2] : vector<4x8x8xf32> to vector<4x8xf32>
    %58 = vector.shape_cast %57 : vector<4x8xf32> to vector<4x8x1xf32>
    %59 = vector.broadcast %58 : vector<4x8x1xf32> to vector<4x8x8xf32>
    %60 = arith.subf %56, %59 : vector<4x8x8xf32>
    %61 = math.exp %60 : vector<4x8x8xf32>
    %cst_29 = arith.constant dense<0.000000e+00> : vector<4x8xf32>
    %62 = vector.multi_reduction <add>, %61, %cst_29 [2] : vector<4x8x8xf32> to vector<4x8xf32>
    %63 = vector.shape_cast %62 : vector<4x8xf32> to vector<4x8x1xf32>
    %64 = tpu.reciprocal %63 {approx = true} : vector<4x8x1xf32> -> vector<4x8x1xf32>
    %65 = vector.broadcast %64 : vector<4x8x1xf32> to vector<4x8x8xf32>
    %66 = arith.mulf %61, %65 : vector<4x8x8xf32>
    %67 = arith.truncf %66 : vector<4x8x8xf32> to vector<4x8x8xbf16>
    "tpu.trace_start"() <{level = 10 : i32, message = "hqk,hkd->hqd"}> : () -> ()
    %cst_30 = arith.constant dense<0.000000e+00> : vector<4x8x32xf32>
    %68 = tpu.matmul %67, %49, %cst_30 {dimension_numbers = #tpu.dot_dimension_numbers<[2], [1], [1], [2], [0, 0, 0, 1, 1, 2], [0], [0]>} : vector<4x8x8xbf16>, vector<4x8x32xbf16>, vector<4x8x32xf32> -> vector<4x8x32xf32>
    "tpu.trace_stop"() : () -> ()
    %69 = tpu.transpose %68, [1, 0, 2] : vector<4x8x32xf32> -> vector<8x4x32xf32>
    %70 = vector.shape_cast %69 : vector<8x4x32xf32> to vector<8x128xf32>
    %71 = arith.truncf %70 : vector<8x128xf32> to vector<8x128xbf16>
    %c0_31 = arith.constant 0 : index
    %c0_32 = arith.constant 0 : index
    %c0_33 = arith.constant 0 : index
    %72 = vector.load %arg11[%c0_31, %c0_32, %c0_33] : memref<1x128x128xbf16, #tpu.memory_space<vmem>>, vector<1x128x128xbf16>
    %73 = vector.shape_cast %72 : vector<1x128x128xbf16> to vector<128x128xbf16>
    %cst_34 = arith.constant dense<0.000000e+00> : vector<8x128xf32>
    %74 = tpu.matmul %71, %73, %cst_34 {dimension_numbers = #tpu.dot_dimension_numbers<[1], [0], [0], [1], [0, 0, 1, 1], [], []>} : vector<8x128xbf16>, vector<128x128xbf16>, vector<8x128xf32> -> vector<8x128xf32>
    %75 = arith.addf %3, %74 : vector<8x128xf32>
    %76 = arith.mulf %75, %75 : vector<8x128xf32>
    %cst_35 = arith.constant dense<0.000000e+00> : vector<8xf32>
    %77 = vector.multi_reduction <add>, %76, %cst_35 [1] : vector<8x128xf32> to vector<8xf32>
    %78 = vector.shape_cast %77 : vector<8xf32> to vector<8x1xf32>
    %cst_36 = arith.constant 1.280000e+02 : f32
    %79 = vector.broadcast %cst_36 : f32 to vector<8x1xf32>
    %80 = arith.divf %78, %79 : vector<8x1xf32>
    %cst_37 = arith.constant 9.99999997E-7 : f32
    %81 = vector.broadcast %cst_37 : f32 to vector<8x1xf32>
    %82 = arith.addf %80, %81 : vector<8x1xf32>
    %83 = math.rsqrt %82 : vector<8x1xf32>
    %84 = vector.broadcast %83 : vector<8x1xf32> to vector<8x128xf32>
    %85 = arith.mulf %75, %84 : vector<8x128xf32>
    %86 = arith.truncf %85 : vector<8x128xf32> to vector<8x128xbf16>
    %c0_38 = arith.constant 0 : index
    %c0_39 = arith.constant 0 : index
    %c0_40 = arith.constant 0 : index
    %87 = vector.load %arg12[%c0_38, %c0_39, %c0_40] : memref<1x128x256xbf16, #tpu.memory_space<vmem>>, vector<1x128x256xbf16>
    %88 = vector.shape_cast %87 : vector<1x128x256xbf16> to vector<128x256xbf16>
    %cst_41 = arith.constant dense<0.000000e+00> : vector<8x256xf32>
    %89 = tpu.matmul %86, %88, %cst_41 {dimension_numbers = #tpu.dot_dimension_numbers<[1], [0], [0], [1], [0, 0, 1, 1], [], []>} : vector<8x128xbf16>, vector<128x256xbf16>, vector<8x256xf32> -> vector<8x256xf32>
    %c0_42 = arith.constant 0 : index
    %c0_43 = arith.constant 0 : index
    %c0_44 = arith.constant 0 : index
    %90 = vector.load %arg13[%c0_42, %c0_43, %c0_44] : memref<1x128x256xbf16, #tpu.memory_space<vmem>>, vector<1x128x256xbf16>
    %91 = vector.shape_cast %90 : vector<1x128x256xbf16> to vector<128x256xbf16>
    %cst_45 = arith.constant dense<0.000000e+00> : vector<8x256xf32>
    %92 = tpu.matmul %86, %91, %cst_45 {dimension_numbers = #tpu.dot_dimension_numbers<[1], [0], [0], [1], [0, 0, 1, 1], [], []>} : vector<8x128xbf16>, vector<128x256xbf16>, vector<8x256xf32> -> vector<8x256xf32>
    %93 = arith.negf %89 : vector<8x256xf32>
    %94 = math.exp %93 : vector<8x256xf32>
    %cst_46 = arith.constant 1.000000e+00 : f32
    %95 = vector.broadcast %cst_46 : f32 to vector<8x256xf32>
    %96 = arith.addf %95, %94 : vector<8x256xf32>
    %97 = arith.divf %95, %96 : vector<8x256xf32>
    %98 = arith.mulf %89, %97 : vector<8x256xf32>
    %99 = arith.mulf %98, %92 : vector<8x256xf32>
    %100 = arith.truncf %99 : vector<8x256xf32> to vector<8x256xbf16>
    %c0_47 = arith.constant 0 : index
    %c0_48 = arith.constant 0 : index
    %c0_49 = arith.constant 0 : index
    %101 = vector.load %arg14[%c0_47, %c0_48, %c0_49] : memref<1x256x128xbf16, #tpu.memory_space<vmem>>, vector<1x256x128xbf16>
    %102 = vector.shape_cast %101 : vector<1x256x128xbf16> to vector<256x128xbf16>
    %cst_50 = arith.constant dense<0.000000e+00> : vector<8x128xf32>
    %103 = tpu.matmul %100, %102, %cst_50 {dimension_numbers = #tpu.dot_dimension_numbers<[1], [0], [0], [1], [0, 0, 1, 1], [], []>} : vector<8x256xbf16>, vector<256x128xbf16>, vector<8x128xf32> -> vector<8x128xf32>
    %104 = arith.addf %75, %103 : vector<8x128xf32>
    %c0_51 = arith.constant 0 : index
    %c0_52 = arith.constant 0 : index
    %105 = vector.load %arg17[%c0_51, %c0_52] : memref<8x128xf32, #tpu.memory_space<vmem>>, vector<8x128xf32>
    tpu.vector_store %arg17[%c0_51, %c0_52], %104 {strides = array<i32>} : memref<8x128xf32, #tpu.memory_space<vmem>>, vector<8x128xf32>,
    %c1_i32 = arith.constant 1 : i32
    %106 = arith.cmpi eq, %arg0, %c1_i32 : i32
    %107 = arith.extui %106 : i1 to i32
    %c0_i32_53 = arith.constant 0 : i32
    %108 = arith.cmpi ne, %107, %c0_i32_53 : i32
    scf.if %108 {
      %c0_54 = arith.constant 0 : index
      %c0_55 = arith.constant 0 : index
      %109 = vector.load %arg17[%c0_54, %c0_55] : memref<8x128xf32, #tpu.memory_space<vmem>>, vector<8x128xf32>
      %110 = arith.mulf %109, %109 : vector<8x128xf32>
      %cst_56 = arith.constant dense<0.000000e+00> : vector<8xf32>
      %111 = vector.multi_reduction <add>, %110, %cst_56 [1] : vector<8x128xf32> to vector<8xf32>
      %112 = vector.shape_cast %111 : vector<8xf32> to vector<8x1xf32>
      %cst_57 = arith.constant 1.280000e+02 : f32
      %113 = vector.broadcast %cst_57 : f32 to vector<8x1xf32>
      %114 = arith.divf %112, %113 : vector<8x1xf32>
      %cst_58 = arith.constant 9.99999997E-7 : f32
      %115 = vector.broadcast %cst_58 : f32 to vector<8x1xf32>
      %116 = arith.addf %114, %115 : vector<8x1xf32>
      %117 = math.rsqrt %116 : vector<8x1xf32>
      %118 = vector.broadcast %117 : vector<8x1xf32> to vector<8x128xf32>
      %119 = arith.mulf %109, %118 : vector<8x128xf32>
      %c0_59 = arith.constant 0 : index
      %c0_60 = arith.constant 0 : index
      %120 = vector.load %arg6[%c0_59, %c0_60] : memref<1x128xf32, #tpu.memory_space<vmem>>, vector<1x128xf32>
      %121 = vector.broadcast %120 : vector<1x128xf32> to vector<8x128xf32>
      %122 = arith.mulf %119, %121 : vector<8x128xf32>
      %c0_61 = arith.constant 0 : index
      %c0_62 = arith.constant 0 : index
      %123 = vector.load %arg15[%c0_61, %c0_62] : memref<8x128xf32, #tpu.memory_space<vmem>>, vector<8x128xf32>
      tpu.vector_store %arg15[%c0_61, %c0_62], %122 {strides = array<i32>} : memref<8x128xf32, #tpu.memory_space<vmem>>, vector<8x128xf32>,
      %124 = arith.truncf %122 : vector<8x128xf32> to vector<8x128xbf16>
      %c0_63 = arith.constant 0 : index
      %c0_64 = arith.constant 0 : index
      %125 = vector.load %arg7[%c0_63, %c0_64] : memref<256x128xbf16, #tpu.memory_space<vmem>>, vector<256x128xbf16>
      %cst_65 = arith.constant dense<0.000000e+00> : vector<8x256xf32>
      %126 = tpu.matmul %124, %125, %cst_65 {dimension_numbers = #tpu.dot_dimension_numbers<[1], [1], [0], [0], [0, 0, 1, 0], [], []>} : vector<8x128xbf16>, vector<256x128xbf16>, vector<8x256xf32> -> vector<8x256xf32>
      %cst_66 = arith.constant 1.000000e+00 : f32
      %127 = vector.broadcast %cst_66 : f32 to vector<8x256xf32>
      %128 = arith.mulf %126, %127 : vector<8x256xf32>
      %c0_67 = arith.constant 0 : index
      %c0_68 = arith.constant 0 : index
      %129 = vector.load %arg16[%c0_67, %c0_68] : memref<8x256xf32, #tpu.memory_space<vmem>>, vector<8x256xf32>
      tpu.vector_store %arg16[%c0_67, %c0_68], %128 {strides = array<i32>} : memref<8x256xf32, #tpu.memory_space<vmem>>, vector<8x256xf32>,
    } else {
    }
    return
  }
  func.func @transform_0(%arg0: i32) -> (i32, i32) {
    %c0_i32 = arith.constant 0 : i32
    %c0_i32_0 = arith.constant 0 : i32
    %c0_i32_1 = arith.constant 0 : i32
    return %c0_i32, %c0_i32_0 : i32, i32
  }
  func.func @transform_1(%arg0: i32) -> (i32, i32) {
    %c0_i32 = arith.constant 0 : i32
    %c0_i32_0 = arith.constant 0 : i32
    %c0_i32_1 = arith.constant 0 : i32
    return %c0_i32, %c0_i32_0 : i32, i32
  }
  func.func @transform_2(%arg0: i32) -> (i32, i32) {
    %c0_i32 = arith.constant 0 : i32
    %c0_i32_0 = arith.constant 0 : i32
    %c0_i32_1 = arith.constant 0 : i32
    return %c0_i32, %c0_i32_0 : i32, i32
  }
  func.func @transform_3(%arg0: i32) -> (i32, i32) {
    %c0_i32 = arith.constant 0 : i32
    %c0_i32_0 = arith.constant 0 : i32
    %c0_i32_1 = arith.constant 0 : i32
    return %c0_i32, %c0_i32_0 : i32, i32
  }
  func.func @transform_4(%arg0: i32) -> (i32, i32) {
    %c0_i32 = arith.constant 0 : i32
    %c0_i32_0 = arith.constant 0 : i32
    %c0_i32_1 = arith.constant 0 : i32
    return %c0_i32, %c0_i32_0 : i32, i32
  }
  func.func @transform_5(%arg0: i32) -> (i32, i32) {
    %c0_i32 = arith.constant 0 : i32
    %c0_i32_0 = arith.constant 0 : i32
    %c0_i32_1 = arith.constant 0 : i32
    return %c0_i32, %c0_i32_0 : i32, i32
  }
  func.func @transform_6(%arg0: i32) -> (i32, i32) {
    %c0_i32 = arith.constant 0 : i32
    %c0_i32_0 = arith.constant 0 : i32
    %c0_i32_1 = arith.constant 0 : i32
    return %c0_i32, %c0_i32_0 : i32, i32
  }
  func.func @transform_7(%arg0: i32) -> (i32, i32, i32) {
    %c0_i32 = arith.constant 0 : i32
    %c0_i32_0 = arith.constant 0 : i32
    %c0_i32_1 = arith.constant 0 : i32
    return %arg0, %c0_i32, %c0_i32_0 : i32, i32, i32
  }
  func.func @transform_8(%arg0: i32) -> (i32, i32, i32) {
    %c0_i32 = arith.constant 0 : i32
    %c0_i32_0 = arith.constant 0 : i32
    %c0_i32_1 = arith.constant 0 : i32
    return %arg0, %c0_i32, %c0_i32_0 : i32, i32, i32
  }
  func.func @transform_9(%arg0: i32) -> (i32, i32, i32) {
    %c0_i32 = arith.constant 0 : i32
    %c0_i32_0 = arith.constant 0 : i32
    %c0_i32_1 = arith.constant 0 : i32
    return %arg0, %c0_i32, %c0_i32_0 : i32, i32, i32
  }
  func.func @transform_10(%arg0: i32) -> (i32, i32, i32) {
    %c0_i32 = arith.constant 0 : i32
    %c0_i32_0 = arith.constant 0 : i32
    %c0_i32_1 = arith.constant 0 : i32
    return %arg0, %c0_i32, %c0_i32_0 : i32, i32, i32
  }
  func.func @transform_11(%arg0: i32) -> (i32, i32, i32) {
    %c0_i32 = arith.constant 0 : i32
    %c0_i32_0 = arith.constant 0 : i32
    %c0_i32_1 = arith.constant 0 : i32
    return %arg0, %c0_i32, %c0_i32_0 : i32, i32, i32
  }
  func.func @transform_12(%arg0: i32) -> (i32, i32, i32) {
    %c0_i32 = arith.constant 0 : i32
    %c0_i32_0 = arith.constant 0 : i32
    %c0_i32_1 = arith.constant 0 : i32
    return %arg0, %c0_i32, %c0_i32_0 : i32, i32, i32
  }
  func.func @transform_13(%arg0: i32) -> (i32, i32, i32) {
    %c0_i32 = arith.constant 0 : i32
    %c0_i32_0 = arith.constant 0 : i32
    %c0_i32_1 = arith.constant 0 : i32
    return %arg0, %c0_i32, %c0_i32_0 : i32, i32, i32
  }
  func.func @transform_14(%arg0: i32) -> (i32, i32) {
    %c0_i32 = arith.constant 0 : i32
    %c0_i32_0 = arith.constant 0 : i32
    %c0_i32_1 = arith.constant 0 : i32
    return %c0_i32, %c0_i32_0 : i32, i32
  }
  func.func @transform_15(%arg0: i32) -> (i32, i32) {
    %c0_i32 = arith.constant 0 : i32
    %c0_i32_0 = arith.constant 0 : i32
    %c0_i32_1 = arith.constant 0 : i32
    return %c0_i32, %c0_i32_0 : i32, i32
  }
}

</mosaic_0001>

<bundles_post_ra>
// kernel: tpu_custom_call.1
= control target key start
LH: loop header
LB: loop body
LE: loop exit
PB: predicated region body
PF: predicated region fallthrough
CT: control target
= control target key end

     0   :  { %s5299_s0 = inlined_call_operand.hbm [shape: f32[8,128], index: 0, kind: input, shape index: {}]   ;;  %s5300_s1 = inlined_call_operand.hbm [shape: f32[8,128], index: 1, kind: input, shape index: {}]   ;;  %s5301_s2 = inlined_call_operand.hbm [shape: f32[8,128], index: 2, kind: input, shape index: {}]   ;;  %s5302_s3 = inlined_call_operand.vmem [shape: f32[8,128], index: 3, kind: input, shape index: {}]   ;;  %s5303_s4 = inlined_call_operand.hbm [shape: f32[8,8], index: 4, kind: input, shape index: {}]   ;;  %s5304_s5 = inlined_call_operand.vmem [shape: f32[1,128], index: 5, kind: input, shape index: {}]   ;;  %s5305_s6 = inlined_call_operand.hbm [shape: bf16[256,128], index: 6, kind: input, shape index: {}]   ;;  %s5306_s7 = inlined_call_operand.hbm [shape: bf16[2,128,128], index: 7, kind: input, shape index: {}]   ;;  %s5307_s8 = inlined_call_operand.hbm [shape: bf16[2,128,128], index: 8, kind: input, shape index: {}]   ;;  %s5308_s9 = inlined_call_operand.hbm [shape: bf16[2,128,128], index: 9, kind: input, shape index: {}]   ;;  %s5309_s10 = inlined_call_operand.hbm [shape: bf16[2,128,128], index: 10, kind: input, shape index: {}]   ;;  %s5310_s11 = inlined_call_operand.hbm [shape: bf16[2,128,256], index: 11, kind: input, shape index: {}]   ;;  %s5311_s12 = inlined_call_operand.hbm [shape: bf16[2,128,256], index: 12, kind: input, shape index: {}]   ;;  %s5312_s13 = inlined_call_operand.hbm [shape: bf16[2,256,128], index: 13, kind: input, shape index: {}]   ;;  %s5313_s14 = inlined_call_operand.hbm [shape: f32[8,128], index: 14, kind: output, shape index: {0}]   ;;  %s5314_s15 = inlined_call_operand.hbm [shape: f32[8,256], index: 15, kind: output, shape index: {1}]  }
   0x1   :  { %5348 = sst [smem:[#allocation42_spill]] %s5300_s1 }
   0x2   :  { %5349 = sst [smem:[#allocation43_spill]] %s5302_s3 }
   0x3   :  { %5350 = sst [smem:[#allocation44_spill]] %s5303_s4 }
   0x4   :  { %5351 = sst [smem:[#allocation45_spill]] %s5304_s5 }
   0x5   :  { %5352 = sst [smem:[#allocation46_spill]] %s5306_s7 }
   0x6   :  { %5353 = sst [smem:[#allocation47_spill]] %s5308_s9 }
   0x7   :  { %5354 = sst [smem:[#allocation48_spill]] %s5309_s10 }
   0x8   :  { %5355 = sst [smem:[#allocation49_spill]] %s5311_s12 }
   0x9   :  { %5356 = sst [smem:[#allocation50_spill]] %s5312_s13 }
   0xa   :  { %5357 = sst [smem:[#allocation51_spill]] %s5313_s14 }
   0xb   :  { %5358 = sst [smem:[#allocation52_spill]] %s5314_s15 }
   0xc   :  { %21 = vsyncpa [#allocation4], 0 }
   0xd   :  { %22 = vsyncpa [#allocation7], 0 }
   0xe   :  { %23 = vsyncpa [#allocation10], 0 }
   0xf   :  { %24 = vsyncpa [#allocation13], 0 }
  0x10   :  { %26 = vsyncpa [#allocation13 + $0x1], 0 }
  0x11   :  { %27 = vsyncpa [#allocation16], 0 }
  0x12   :  { %29 = vsyncpa [#allocation16 + $0x1], 0 }
  0x13   :  { %30 = vsyncpa [#allocation19], 0 }
  0x14   :  { %32 = vsyncpa [#allocation19 + $0x1], 0 }
  0x15   :  { %33 = vsyncpa [#allocation22], 0 }
  0x16   :  { %35 = vsyncpa [#allocation22 + $0x1], 0 }
  0x17   :  { %36 = vsyncpa [#allocation5], 0 }
  0x18   :  { %37 = vsyncpa [#allocation25], 0  ;;  %s4465_s18 = smov 0   ;;  %s4467_s19 = smov 0  }
  0x19   :  { %s4469_s20 = smov 0   ;;  %s4471_s21 = smov 0  }
  0x1a LB: > { %5359 = sst [smem:[#allocation35_spill]] %s4347_s19  ;;  %s4484_s22 = sadd.s32 4294967295, %s4355_s21   ;;  %s4355_s21 = sphi %s4471_s21, %s5411_s21   ;;  %s4351_s20 = sphi %s4469_s20, %s5414_s20   ;;  %s4347_s19 = sphi %s4467_s19, %s5413_s19   ;;  %s4343_s18 = sphi %s4465_s18, %s5412_s18  }
  0x1b   : > { %5360 = sst [smem:[#allocation36_spill]] %s4351_s20  ;;  %p210_p0 = scmp.ne.s32.totalorder %s4347_s19, %s4343_s18 }
  0x1c   : > { %5361 = sst [smem:[#allocation37_spill]] %s4484_s22  ;;  %p5317_p1 = scmp.eq.s32.totalorder %s4484_s22, 0 }
  0x1d   : > { %p3205_p2 = scmp.ge.s32.totalorder %s4355_s21, 1  ;;  %p419_p3 = scmp.lt.s32.totalorder %s4355_s21, 3 }
  0x1e   : > { %p4493_p5 = por %p5317_p1, %p210_p0  ;;  %s4357_s25 = smov [#allocation6]  }
  0x1f   : > { %p4497_p6 = pnand %p3205_p2, %p419_p3  ;;  %s443_s26 = sshll.u32 %s4357_s25, 4  ;;  %s444_s26 = int_to_ptr.vmem [resolvable:$true] %s443_s26 }
  0x20   : > { %s5362_s23 = scalar_select %p4493_p5, 1, 0 }
  0x21   : > { %s5364_s24 = scalar_select %p4497_p6, 1, 0 }
  0x22   : > { %5363 = sst [smem:[#allocation38_spill]] %s5362_s23  ;;  %p3638_p7 = pneg %p4497_p6 }
  0x23   : > { %5365 = sst [smem:[#allocation39_spill]] %s5364_s24  ;;  %s4358_s27 = smov [#allocation9]  }
  0x24   : > { %s468_s28 = sshll.u32 %s4358_s27, 4  ;;  %p4505_p8 = pnand %p3638_p7, %p5317_p1  ;;  %s4509_s28 = int_to_ptr.vmem [resolvable:$true] %s468_s28 }
  0x25   : > { %s4512_s30 = sadd.s32 1, %s4355_s21   ;;  %s5368_s1 = sld [smem:[#allocation42_spill]] }
  0x26   : > { %s5366_s29 = scalar_select %p4505_p8, 1, 0 }
  0x27   : > { %5367 = sst [smem:[#allocation40_spill]] %s4512_s30  ;;  %p4524_p10 = pneg %p4505_p8 }
  0x29   : > { %s5369_s27 = scalar_select %p4524_p10, 1, 0 }
  0x2b   : > { %s3887_s25 = scalar_lea.hbm %s5368_s1, 128 }
  0x2c   : > { %p3888_p9 = scmp.ne.s32.totalorder %s5368_s1, %s3887_s25  ;;  %p3894_p13 = scmp.lt.u32.totalorder %s3887_s25, %s5368_s1 }
  0x2e   : > { %p3890_p11 = pnand %p4524_p10, %p3888_p9 }
  0x30   : > { %p3891_p12 = pneg %p3890_p11 }
  0x32   : > { %p3896_p0 = pnand %p3894_p13, %p3891_p12 }
  0x34   : > { %3899 = shalt.err (!%p3896_p0)
}
  0x35   : > { %s3900_s17 = scalar_lea.vmem %s444_s26, 128  ;;  %p3908_p4 = scmp.lt.s32.totalorder %s444_s26, %s444_s26 }
  0x36   : > { %p3901_p2 = scmp.ne.s32.totalorder %s444_s26, %s3900_s17  ;;  %p3909_p1 = scmp.lt.s32.totalorder %s3900_s17, %s3900_s17 }
  0x38   : > { %p3903_p3 = pnand %p3901_p2, %p4524_p10  ;;  %p3910_p5 = por %p3909_p1, %p3908_p4 }
  0x3a   : > { %p3904_p7 = pneg %p3903_p3 }
  0x3c   : > { %p3911_p6 = pnand %p3910_p5, %p3904_p7 }
  0x3e   : > { %3914 = shalt.err (!%p3911_p6)
}
  0x3f   : > { %3644 = dma.hbm_to_vmem [thread:$0]  (!%p4505_p8), %s5368_s1, 128, %s444_s26, [#allocation7]  }
  0x40   : > { %s5370_s4 = sld [smem:[#allocation44_spill]] }
  0x46   : > { %s3915_s18 = scalar_lea.hbm %s5370_s4, 128 }
  0x47   : > { %p3916_p9 = scmp.ne.s32.totalorder %s5370_s4, %s3915_s18  ;;  %p3922_p4 = scmp.lt.u32.totalorder %s3915_s18, %s5370_s4 }
  0x49   : > { %p3918_p11 = pnand %p3916_p9, %p4524_p10 }
  0x4b   : > { %p3919_p1 = pneg %p3918_p11 }
  0x4d   : > { %p3924_p5 = pnand %p3922_p4, %p3919_p1 }
  0x4f   : > { %3927 = shalt.err (!%p3924_p5)
}
  0x50   : > { %s3928_s26 = scalar_lea.vmem %s4509_s28, 128  ;;  %p3936_p0 = scmp.lt.s32.totalorder %s4509_s28, %s4509_s28 }
  0x51   : > { %p3929_p6 = scmp.ne.s32.totalorder %s4509_s28, %s3928_s26  ;;  %p3937_p2 = scmp.lt.s32.totalorder %s3928_s26, %s3928_s26 }
  0x53   : > { %p3931_p12 = pnand %p3929_p6, %p4524_p10  ;;  %p3938_p3 = por %p3937_p2, %p3936_p0 }
  0x55   : > { %p3932_p13 = pneg %p3931_p12 }
  0x57   : > { %p3939_p7 = pnand %p3938_p3, %p3932_p13 }
  0x59   : > { %3942 = shalt.err (!%p3939_p7)
}
  0x5a   : > { %3650 = dma.hbm_to_vmem [thread:$0]  (!%p4505_p8), %s5370_s4, 128, %s4509_s28, [#allocation10]  }
  0x5b   : > { %s5371_s14 = ssub.s32 %s4355_s21, %s4512_s30  ;;  %s197_s15 = sadd.s32 1, %s4351_s20 }
  0x5c   : > { %p195_p9 = scmp.eq.s32.totalorder %s5371_s14, 0  ;;  %p204_p11 = scmp.ne.s32.totalorder %s4351_s20, %s4347_s19 }
  0x5d   : > { %p205_p1 = scmp.eq.s32.totalorder %s4355_s21, 0  ;;  %p3681_p5 = scmp.lt.s32.totalorder %s4355_s21, 2 }
  0x5e   : > { %s4571_s3 = scalar_select %p195_p9, %s4351_s20, %s197_s15  }
  0x5f   : > { %p206_p4 = por %p205_p1, %p204_p11  ;;  %s4575_s5 = sand.u32 1, %s4355_s21  }
  0x60   : > { %5372 = sst [smem:[#allocation41_spill]] %s4571_s3  ;;  %s4578_s18 = sand.u32 1, %s4351_s20  }
  0x61   : > { %s4581_s25 = sshll.u32 %s4578_s18, 6  ;;  %s4584_s17 = sshll.u32 %s4355_s21, 10 }
  0x62   : > { %s5373_s7 = sld [smem:[#allocation46_spill]]  ;;  %s499_s16 = scalar_lea.vmem [#allocation12], %s4581_s25 }
  0x63   : > { %s506_s14 = sshll.u32 %s499_s16, 4  ;;  %p4595_p6 = pnand %p3681_p5, %p206_p4  ;;  %s4593_s14 = int_to_ptr.vmem [resolvable:$true] %s506_s14 }
  0x64   : > { %s5375_s9 = sld [smem:[#allocation47_spill]] }
  0x65   : > { %s5374_s15 = scalar_select %p4595_p6, 1, 0 }
  0x66   : > { %p4610_p13 = pneg %p4595_p6 }
  0x68   : > { %s4590_s23 = scalar_lea.hbm %s5373_s7, %s4584_s17  ;;  %s3948_s19 = scalar_lea.hbm %s5373_s7, 2048 }
  0x69   : > { %s3943_s3 = scalar_lea.hbm %s4590_s23, 1024  ;;  %p3949_p3 = scmp.lt.u32.totalorder %s4590_s23, %s5373_s7 }
  0x6a   : > { %s4603_s28 = scalar_lea.hbm %s5375_s9, %s4584_s17  ;;  %p3944_p12 = scmp.ne.s32.totalorder %s4590_s23, %s3943_s3 }
  0x6b   : > { %s5376_s20 = scalar_select %p4610_p13, 1, 0 }
  0x6c   : > { %p3946_p0 = pnand %p4610_p13, %p3944_p12  ;;  %p3950_p7 = scmp.lt.u32.totalorder %s3948_s19, %s3943_s3 }
  0x6d   : > { %p3952_p11 = scmp.lt.u32.totalorder %s3943_s3, %s4590_s23 }
  0x6e   : > { %p3947_p2 = pneg %p3946_p0  ;;  %p3951_p9 = por %p3950_p7, %p3949_p3 }
  0x70   : > { %p3953_p1 = por %p3952_p11, %p3951_p9 }
  0x72   : > { %p3954_p4 = pnand %p3953_p1, %p3947_p2 }
  0x74   : > { %3957 = shalt.err (!%p3954_p4)
}
  0x75   : > { %s3958_s26 = scalar_lea.vmem %s4593_s14, 1024  ;;  %s4359_s30 = smov [#allocation12]  }
  0x76   : > { %p3959_p5 = scmp.ne.s32.totalorder %s4593_s14, %s3958_s26  ;;  %s3963_s16 = sshll.u32 %s4359_s30, 4  ;;  %s3964_s16 = int_to_ptr.vmem [resolvable:$false] %s3963_s16 }
  0x77   : > { %s3965_s1 = scalar_lea.vmem %s3964_s16, 2048  ;;  %p3966_p8 = scmp.lt.s32.totalorder %s4593_s14, %s3964_s16 }
  0x78   : > { %p3961_p12 = pnand %p3959_p5, %p4610_p13  ;;  %p3967_p10 = scmp.lt.s32.totalorder %s3965_s1, %s3958_s26 }
  0x7a   : > { %p3962_p0 = pneg %p3961_p12  ;;  %p3968_p3 = por %p3967_p10, %p3966_p8 }
  0x7c   : > { %p3969_p7 = pnand %p3968_p3, %p3962_p0 }
  0x7e   : > { %3972 = shalt.err (!%p3969_p7)
}
  0x7f   : > { %s5338_s19 = smov 64   ;;  %s5340_s3 = smov 4  }
  0x80   : > { %s5377_s26 = scalar_lea.sflag [#allocation13], %s4575_s5  ;;  %s541_s4 = scalar_lea.vmem [#allocation15], %s4581_s25 }
  0x81   : > { %3657 = dma.hbm_to_vmem [thread:$0]  (!%p4595_p6), %s4590_s23, 1024, %s4593_s14, %s5377_s26, %s5338_s19, %s5338_s19, %s5340_s3  }
  0x82   : > { %s548_s30 = sshll.u32 %s541_s4, 4  ;;  %s4642_s16 = sshll.u32 %s4578_s18, 7  ;;  %s4639_s30 = int_to_ptr.vmem [resolvable:$true] %s548_s30 }
  0x83   : > { %s5337_s1 = scalar_lea.sflag [#allocation16], %s4575_s5  ;;  %s3973_s7 = scalar_lea.hbm %s4603_s28, 1024 }
  0x84   : > { %p3974_p8 = scmp.ne.s32.totalorder %s4603_s28, %s3973_s7  ;;  %s3978_s13 = scalar_lea.hbm %s5375_s9, 2048 }
  0x85   : > { %p3979_p9 = scmp.lt.u32.totalorder %s4603_s28, %s5375_s9  ;;  %p3980_p11 = scmp.lt.u32.totalorder %s3978_s13, %s3973_s7 }
  0x86   : > { %p3976_p10 = pnand %p3974_p8, %p4610_p13  ;;  %p3982_p4 = scmp.lt.u32.totalorder %s3973_s7, %s4603_s28 }
  0x87   : > { %p3981_p1 = por %p3980_p11, %p3979_p9 }
  0x88   : > { %p3977_p2 = pneg %p3976_p10 }
  0x89   : > { %p3983_p5 = por %p3982_p4, %p3981_p1 }
  0x8b   : > { %p3984_p12 = pnand %p3983_p5, %p3977_p2 }
  0x8d   : > { %3987 = shalt.err (!%p3984_p12)
}
  0x8e   : > { %s3988_s23 = scalar_lea.vmem %s4639_s30, 1024  ;;  %s4362_s22 = smov [#allocation15]  }
  0x8f   : > { %p3989_p0 = scmp.ne.s32.totalorder %s4639_s30, %s3988_s23  ;;  %s3993_s24 = sshll.u32 %s4362_s22, 4  ;;  %s3994_s24 = int_to_ptr.vmem [resolvable:$false] %s3993_s24 }
  0x90   : > { %s3995_s10 = scalar_lea.vmem %s3994_s24, 2048  ;;  %p3996_p8 = scmp.lt.s32.totalorder %s4639_s30, %s3994_s24 }
  0x91   : > { %p3991_p3 = pnand %p3989_p0, %p4610_p13  ;;  %p3997_p10 = scmp.lt.s32.totalorder %s3995_s10, %s3988_s23 }
  0x93   : > { %p3992_p7 = pneg %p3991_p3  ;;  %p3998_p9 = por %p3997_p10, %p3996_p8 }
  0x95   : > { %p3999_p11 = pnand %p3998_p9, %p3992_p7 }
  0x97   : > { %4002 = shalt.err (!%p3999_p11)
}
  0x98   : > { %3663 = dma.hbm_to_vmem [thread:$0]  (!%p4595_p6), %s4603_s28, 1024, %s4639_s30, %s5337_s1, %s5338_s19, %s5338_s19, %s5340_s3  }
  0x99   : > { %s4672_s7 = sshll.u32 %s4355_s21, 11  ;;  %s583_s26 = scalar_lea.vmem [#allocation18], %s4642_s16 }
  0x9a   : > { %s4678_s14 = scalar_lea.hbm %s5310_s11, %s4672_s7  ;;  %s590_s4 = sshll.u32 %s583_s26, 4  ;;  %s4681_s4 = int_to_ptr.vmem [resolvable:$true] %s590_s4 }
  0x9b   : > { %s5346_s23 = scalar_lea.sflag [#allocation19], %s4575_s5  ;;  %s4003_s22 = scalar_lea.hbm %s4678_s14, 2048 }
  0x9c   : > { %p4004_p2 = scmp.ne.s32.totalorder %s4678_s14, %s4003_s22  ;;  %s4008_s30 = scalar_lea.hbm %s5310_s11, 4096 }
  0x9d   : > { %p4009_p5 = scmp.lt.u32.totalorder %s4678_s14, %s5310_s11  ;;  %p4010_p12 = scmp.lt.u32.totalorder %s4008_s30, %s4003_s22 }
  0x9e   : > { %p4006_p1 = pnand %p4004_p2, %p4610_p13  ;;  %p4012_p3 = scmp.lt.u32.totalorder %s4003_s22, %s4678_s14 }
  0x9f   : > { %p4011_p0 = por %p4010_p12, %p4009_p5 }
  0xa0   : > { %p4007_p4 = pneg %p4006_p1 }
  0xa1   : > { %p4013_p7 = por %p4012_p3, %p4011_p0 }
  0xa3   : > { %p4014_p8 = pnand %p4013_p7, %p4007_p4 }
  0xa5   : > { %4017 = shalt.err (!%p4014_p8)
}
  0xa6   : > { %s4018_s12 = scalar_lea.vmem %s4681_s4, 2048  ;;  %s4363_s13 = smov [#allocation18]  }
  0xa7   : > { %p4019_p10 = scmp.ne.s32.totalorder %s4681_s4, %s4018_s12  ;;  %s4023_s26 = sshll.u32 %s4363_s13, 4  ;;  %s4024_s26 = int_to_ptr.vmem [resolvable:$false] %s4023_s26 }
  0xa8   : > { %s4025_s21 = scalar_lea.vmem %s4024_s26, 4096  ;;  %p4026_p2 = scmp.lt.s32.totalorder %s4681_s4, %s4024_s26 }
  0xa9   : > { %p4021_p9 = pnand %p4019_p10, %p4610_p13  ;;  %p4027_p1 = scmp.lt.s32.totalorder %s4025_s21, %s4018_s12 }
  0xab   : > { %p4022_p11 = pneg %p4021_p9  ;;  %p4028_p5 = por %p4027_p1, %p4026_p2 }
  0xad   : > { %p4029_p12 = pnand %p4028_p5, %p4022_p11 }
  0xaf   : > { %4032 = shalt.err (!%p4029_p12)
}
  0xb0   : > { %s5347_s22 = smov 128   ;;  %s4365_s28 = smov 8  }
  0xb1   : > { %3669 = dma.hbm_to_vmem [thread:$0]  (!%p4595_p6), %s4678_s14, 2048, %s4681_s4, %s5346_s23, %s5347_s22, %s5347_s22, %s4365_s28  }
  0xb2   : > { %s4366_s30 = smov [#allocation3]   ;;  %s4367_s10 = smov [#allocation8]  }
  0xb3   : > { %s432_s24 = sshll.u32 %s4366_s30, 4  ;;  %s454_s12 = sshll.u32 %s4367_s10, 4  ;;  %s433_s24 = int_to_ptr.vmem [resolvable:$true] %s432_s24  ;;  %s455_s12 = int_to_ptr.vmem [resolvable:$true] %s454_s12 }
  0xb4   : > { %s4033_s21 = scalar_lea.hbm %s5299_s0, 128  ;;  %p5378_p0 = scmp.ne.s32.totalorder %s5369_s27, 0 }
  0xb5   : > { %p4034_p4 = scmp.ne.s32.totalorder %s5299_s0, %s4033_s21  ;;  %p4040_p8 = scmp.lt.u32.totalorder %s4033_s21, %s5299_s0 }
  0xb7   : > { %p4036_p3 = pnand %p4034_p4, %p5378_p0 }
  0xb9   : > { %p4037_p7 = pneg %p4036_p3 }
  0xbb   : > { %p4042_p10 = pnand %p4040_p8, %p4037_p7 }
  0xbd   : > { %4045 = shalt.err (!%p4042_p10)
}
  0xbe   : > { %s4046_s14 = scalar_lea.vmem %s433_s24, 128  ;;  %p4054_p1 = scmp.lt.s32.totalorder %s433_s24, %s433_s24 }
  0xbf   : > { %p4047_p9 = scmp.ne.s32.totalorder %s433_s24, %s4046_s14  ;;  %p4055_p5 = scmp.lt.s32.totalorder %s4046_s14, %s4046_s14 }
  0xc1   : > { %p4049_p11 = pnand %p4047_p9, %p5378_p0  ;;  %p4056_p12 = por %p4055_p5, %p4054_p1 }
  0xc3   : > { %p4050_p2 = pneg %p4049_p11 }
  0xc5   : > { %p4057_p6 = pnand %p4056_p12, %p4050_p2 }
  0xc7   : > { %4060 = shalt.err (!%p4057_p6)
}
  0xc8   : > { %p5379_p4 = scmp.ne.s32.totalorder %s5366_s29, 0  ;;  %s4061_s4 = scalar_lea.hbm %s5301_s2, 128 }
  0xc9   : > { %p4062_p3 = scmp.ne.s32.totalorder %s5301_s2, %s4061_s4  ;;  %p4068_p6 = scmp.lt.u32.totalorder %s4061_s4, %s5301_s2 }
  0xca   : > { %3641 = dma.hbm_to_vmem [thread:$0]  (!%p5379_p4), %s5299_s0, 128, %s433_s24, [#allocation4]  }
  0xcb   : > { %p4064_p7 = pnand %p4062_p3, %p5378_p0 }
  0xcd   : > { %p4065_p8 = pneg %p4064_p7 }
  0xcf   : > { %p4070_p10 = pnand %p4068_p6, %p4065_p8 }
  0xd1   : > { %4073 = shalt.err (!%p4070_p10)
}
  0xd2   : > { %s4074_s21 = scalar_lea.vmem %s455_s12, 128  ;;  %p4082_p1 = scmp.lt.s32.totalorder %s455_s12, %s455_s12 }
  0xd3   : > { %p4075_p9 = scmp.ne.s32.totalorder %s455_s12, %s4074_s21  ;;  %p4083_p5 = scmp.lt.s32.totalorder %s4074_s21, %s4074_s21 }
  0xd5   : > { %p4077_p11 = pnand %p4075_p9, %p5378_p0  ;;  %p4084_p12 = por %p4083_p5, %p4082_p1 }
  0xd7   : > { %p4078_p2 = pneg %p4077_p11 }
  0xd9   : > { %p4085_p13 = pnand %p4084_p12, %p4078_p2 }
  0xdb   : > { %4088 = shalt.err (!%p4085_p13)
}
  0xdc   : > { %3647 = dma.hbm_to_vmem [thread:$0]  (!%p5379_p4), %s5301_s2, 128, %s455_s12, [#allocation7]  }
  0xdd   : > { %s4368_s19 = smov [#allocation11]   ;;  %s4750_s4 = scalar_lea.hbm %s5307_s8, %s4584_s17 }
  0xde   : > { %s481_s1 = sshll.u32 %s4368_s19, 4  ;;  %s4089_s13 = scalar_lea.hbm %s5305_s6, 2048  ;;  %s482_s1 = int_to_ptr.vmem [resolvable:$true] %s481_s1 }
  0xdf   : > { %p4090_p13 = scmp.ne.s32.totalorder %s5305_s6, %s4089_s13  ;;  %p4096_p8 = scmp.lt.u32.totalorder %s4089_s13, %s5305_s6 }
  0xe1   : > { %p4092_p3 = pnand %p4090_p13, %p5378_p0 }
  0xe3   : > { %p4093_p7 = pneg %p4092_p3 }
  0xe5   : > { %p4098_p6 = pnand %p4096_p8, %p4093_p7 }
  0xe7   : > { %4101 = shalt.err (!%p4098_p6)
}
  0xe8   : > { %s4102_s14 = scalar_lea.vmem %s482_s1, 2048  ;;  %p4110_p2 = scmp.lt.s32.totalorder %s482_s1, %s482_s1 }
  0xe9   : > { %p4103_p10 = scmp.ne.s32.totalorder %s482_s1, %s4102_s14  ;;  %p4111_p1 = scmp.lt.s32.totalorder %s4102_s14, %s4102_s14 }
  0xeb   : > { %p4105_p9 = pnand %p4103_p10, %p5378_p0  ;;  %p4112_p5 = por %p4111_p1, %p4110_p2 }
  0xed   : > { %p4106_p11 = pneg %p4105_p9 }
  0xef   : > { %p4113_p12 = pnand %p4112_p5, %p4106_p11 }
  0xf1   : > { %4116 = shalt.err (!%p4113_p12)
}
  0xf2   : > { %s5380_s19 = smov 4   ;;  %s5381_s9 = smov 64  }
  0xf3   : > { %3653 = dma.hbm_to_vmem [thread:$0]  (!%p5379_p4), %s5305_s6, 2048, %s482_s1, [#allocation10], %s5381_s9, %s5381_s9, %s5380_s19  }
  0xf4   : > { %s520_s27 = scalar_lea.vmem [#allocation14], %s4581_s25  ;;  %s5382_s26 = sld [smem:[#allocation48_spill]] }
  0xf5   : > { %s527_s10 = sshll.u32 %s520_s27, 4  ;;  %s4117_s12 = scalar_lea.hbm %s4750_s4, 1024  ;;  %s4774_s10 = int_to_ptr.vmem [resolvable:$true] %s527_s10 }
  0xf6   : > { %p4118_p0 = scmp.ne.s32.totalorder %s4750_s4, %s4117_s12  ;;  %p5383_p13 = scmp.ne.s32.totalorder %s5376_s20, 0 }
  0xf7   : > { %s4122_s3 = scalar_lea.hbm %s5307_s8, 2048  ;;  %p4123_p4 = scmp.lt.u32.totalorder %s4750_s4, %s5307_s8 }
  0xf8   : > { %p4120_p3 = pnand %p4118_p0, %p5383_p13  ;;  %p4124_p8 = scmp.lt.u32.totalorder %s4122_s3, %s4117_s12 }
  0xf9   : > { %p4126_p10 = scmp.lt.u32.totalorder %s4117_s12, %s4750_s4 }
  0xfa   : > { %s4780_s21 = scalar_lea.hbm %s5382_s26, %s4584_s17  ;;  %p4121_p7 = pneg %p4120_p3 }
  0xfb   : > { %p4125_p6 = por %p4124_p8, %p4123_p4 }
  0xfd   : > { %p4127_p9 = por %p4126_p10, %p4125_p6 }
  0xff   : > { %p4128_p11 = pnand %p4127_p9, %p4121_p7 }
 0x101   : > { %4131 = shalt.err (!%p4128_p11)
}
 0x102   : > { %s4132_s17 = scalar_lea.vmem %s4774_s10, 1024  ;;  %s4369_s27 = smov [#allocation14]  }
 0x103   : > { %p4133_p2 = scmp.ne.s32.totalorder %s4774_s10, %s4132_s17  ;;  %s4137_s13 = sshll.u32 %s4369_s27, 4  ;;  %s4138_s13 = int_to_ptr.vmem [resolvable:$false] %s4137_s13 }
 0x104   : > { %s4139_s29 = scalar_lea.vmem %s4138_s13, 2048  ;;  %p4140_p12 = scmp.lt.s32.totalorder %s4774_s10, %s4138_s13 }
 0x105   : > { %p4135_p1 = pnand %p4133_p2, %p5383_p13  ;;  %p4141_p0 = scmp.lt.s32.totalorder %s4139_s29, %s4132_s17 }
 0x107   : > { %p4136_p5 = pneg %p4135_p1  ;;  %p4142_p3 = por %p4141_p0, %p4140_p12 }
 0x109   : > { %p4143_p4 = pnand %p4142_p3, %p4136_p5 }
 0x10b   : > { %4146 = shalt.err (!%p4143_p4)
}
 0x10c   : > { %p5384_p7 = scmp.ne.s32.totalorder %s5374_s15, 0  ;;  %s5385_s12 = scalar_lea.sflag [#allocation13], %s4575_s5 }
 0x10d   : > { %s562_s24 = scalar_lea.vmem [#allocation17], %s4581_s25  ;;  %s5386_s1 = sld [smem:[#allocation49_spill]] }
 0x10e   : > { %3660 = dma.hbm_to_vmem [thread:$0]  (!%p5384_p7), %s4750_s4, 1024, %s4774_s10, %s5385_s12, %s5381_s9, %s5381_s9, %s5380_s19  }
 0x10f   : > { %s569_s14 = sshll.u32 %s562_s24, 4  ;;  %s4147_s27 = scalar_lea.hbm %s4780_s21, 1024  ;;  %s4809_s14 = int_to_ptr.vmem [resolvable:$true] %s569_s14 }
 0x110   : > { %p4148_p8 = scmp.ne.s32.totalorder %s4780_s21, %s4147_s27  ;;  %s4152_s23 = scalar_lea.hbm %s5382_s26, 2048 }
 0x111   : > { %p4153_p9 = scmp.lt.u32.totalorder %s4780_s21, %s5382_s26  ;;  %p4154_p11 = scmp.lt.u32.totalorder %s4152_s23, %s4147_s27 }
 0x112   : > { %p4150_p6 = pnand %p4148_p8, %p5383_p13  ;;  %p4156_p1 = scmp.lt.u32.totalorder %s4147_s27, %s4780_s21 }
 0x113   : > { %s4815_s17 = scalar_lea.hbm %s5386_s1, %s4672_s7  ;;  %p4155_p2 = por %p4154_p11, %p4153_p9 }
 0x114   : > { %p4151_p10 = pneg %p4150_p6 }
 0x115   : > { %p4157_p5 = por %p4156_p1, %p4155_p2 }
 0x117   : > { %p4158_p12 = pnand %p4157_p5, %p4151_p10 }
 0x119   : > { %4161 = shalt.err (!%p4158_p12)
}
 0x11a   : > { %s4162_s25 = scalar_lea.vmem %s4809_s14, 1024  ;;  %s4370_s10 = smov [#allocation17]  }
 0x11b   : > { %p4163_p0 = scmp.ne.s32.totalorder %s4809_s14, %s4162_s25  ;;  %s4167_s12 = sshll.u32 %s4370_s10, 4  ;;  %s4168_s12 = int_to_ptr.vmem [resolvable:$false] %s4167_s12 }
 0x11c   : > { %s4169_s22 = scalar_lea.vmem %s4168_s12, 2048  ;;  %p4170_p8 = scmp.lt.s32.totalorder %s4809_s14, %s4168_s12 }
 0x11d   : > { %p4165_p3 = pnand %p4163_p0, %p5383_p13  ;;  %p4171_p6 = scmp.lt.s32.totalorder %s4169_s22, %s4162_s25 }
 0x11f   : > { %p4166_p4 = pneg %p4165_p3  ;;  %p4172_p9 = por %p4171_p6, %p4170_p8 }
 0x121   : > { %p4173_p11 = pnand %p4172_p9, %p4166_p4 }
 0x123   : > { %4176 = shalt.err (!%p4173_p11)
}
 0x124   : > { %s5387_s23 = scalar_lea.sflag [#allocation16], %s4575_s5  ;;  %s604_s24 = scalar_lea.vmem [#allocation20], %s4642_s16 }
 0x125   : > { %3666 = dma.hbm_to_vmem [thread:$0]  (!%p5384_p7), %s4780_s21, 1024, %s4809_s14, %s5387_s23, %s5381_s9, %s5381_s9, %s5380_s19  }
 0x126   : > { %s611_s3 = sshll.u32 %s604_s24, 4  ;;  %s4177_s30 = scalar_lea.hbm %s4815_s17, 2048  ;;  %s4844_s3 = int_to_ptr.vmem [resolvable:$true] %s611_s3 }
 0x127   : > { %p4178_p10 = scmp.ne.s32.totalorder %s4815_s17, %s4177_s30  ;;  %s4182_s29 = scalar_lea.hbm %s5386_s1, 4096 }
 0x128   : > { %p4183_p5 = scmp.lt.u32.totalorder %s4815_s17, %s5386_s1  ;;  %p4184_p12 = scmp.lt.u32.totalorder %s4182_s29, %s4177_s30 }
 0x129   : > { %p4180_p2 = pnand %p4178_p10, %p5383_p13  ;;  %p4186_p3 = scmp.lt.u32.totalorder %s4177_s30, %s4815_s17 }
 0x12a   : > { %p4185_p0 = por %p4184_p12, %p4183_p5 }
 0x12b   : > { %p4181_p1 = pneg %p4180_p2 }
 0x12c   : > { %p4187_p4 = por %p4186_p3, %p4185_p0 }
 0x12e   : > { %p4188_p8 = pnand %p4187_p4, %p4181_p1 }
 0x130   : > { %4191 = shalt.err (!%p4188_p8)
}
 0x131   : > { %s4192_s21 = scalar_lea.vmem %s4844_s3, 2048  ;;  %s4371_s14 = smov [#allocation20]  }
 0x132   : > { %p4193_p6 = scmp.ne.s32.totalorder %s4844_s3, %s4192_s21  ;;  %s4197_s10 = sshll.u32 %s4371_s14, 4  ;;  %s4198_s10 = int_to_ptr.vmem [resolvable:$false] %s4197_s10 }
 0x133   : > { %s4199_s12 = scalar_lea.vmem %s4198_s10, 4096  ;;  %p4200_p10 = scmp.lt.s32.totalorder %s4844_s3, %s4198_s10 }
 0x134   : > { %p4195_p9 = pnand %p4193_p6, %p5383_p13  ;;  %p4201_p2 = scmp.lt.s32.totalorder %s4199_s12, %s4192_s21 }
 0x136   : > { %p4196_p11 = pneg %p4195_p9  ;;  %p4202_p5 = por %p4201_p2, %p4200_p10 }
 0x138   : > { %p4203_p12 = pnand %p4202_p5, %p4196_p11 }
 0x13a   : > { %4206 = shalt.err (!%p4203_p12)
}
 0x13b   : > { %s5388_s22 = smov 128   ;;  %s5389_s23 = scalar_lea.sflag [#allocation19], %s4575_s5 }
 0x13c   : > { %3672 = dma.hbm_to_vmem [thread:$0]  (!%p5384_p7), %s4815_s17, 2048, %s4844_s3, %s5389_s23, %s5388_s22, %s5388_s22, %s4365_s28  }
 0x13d   : > { %s5390_s27 = sld [smem:[#allocation50_spill]]  ;;  %s625_s29 = scalar_lea.vmem [#allocation21], %s4642_s16 }
 0x13e   : > { %s632_s4 = sshll.u32 %s625_s29, 4  ;;  %s622_s5 = scalar_lea.sflag [#allocation22], %s4578_s18  ;;  %s4879_s4 = int_to_ptr.vmem [resolvable:$true] %s632_s4 }
 0x143   : > { %s4876_s13 = scalar_lea.hbm %s5390_s27, %s4672_s7  ;;  %s4212_s3 = scalar_lea.hbm %s5390_s27, 4096 }
 0x144   : > { %s4207_s25 = scalar_lea.hbm %s4876_s13, 2048  ;;  %p4213_p4 = scmp.lt.u32.totalorder %s4876_s13, %s5390_s27 }
 0x145   : > { %p4208_p1 = scmp.ne.s32.totalorder %s4876_s13, %s4207_s25  ;;  %p4214_p8 = scmp.lt.u32.totalorder %s4212_s3, %s4207_s25 }
 0x146   : > { %p4216_p9 = scmp.lt.u32.totalorder %s4207_s25, %s4876_s13 }
 0x147   : > { %p4210_p0 = pnand %p4208_p1, %p5383_p13  ;;  %p4215_p6 = por %p4214_p8, %p4213_p4 }
 0x149   : > { %p4211_p3 = pneg %p4210_p0  ;;  %p4217_p11 = por %p4216_p9, %p4215_p6 }
 0x14b   : > { %p4218_p10 = pnand %p4217_p11, %p4211_p3 }
 0x14d   : > { %4221 = shalt.err (!%p4218_p10)
}
 0x14e   : > { %s4222_s16 = scalar_lea.vmem %s4879_s4, 2048  ;;  %s4372_s14 = smov [#allocation21]  }
 0x14f   : > { %p4223_p2 = scmp.ne.s32.totalorder %s4879_s4, %s4222_s16  ;;  %s4227_s10 = sshll.u32 %s4372_s14, 4  ;;  %s4228_s10 = int_to_ptr.vmem [resolvable:$false] %s4227_s10 }
 0x150   : > { %s4229_s12 = scalar_lea.vmem %s4228_s10, 4096  ;;  %p4230_p1 = scmp.lt.s32.totalorder %s4879_s4, %s4228_s10 }
 0x151   : > { %p4225_p5 = pnand %p4223_p2, %p5383_p13  ;;  %p4231_p0 = scmp.lt.s32.totalorder %s4229_s12, %s4222_s16 }
 0x153   : > { %p4226_p12 = pneg %p4225_p5  ;;  %p4232_p4 = por %p4231_p0, %p4230_p1 }
 0x155   : > { %p4233_p8 = pnand %p4232_p4, %p4226_p12 }
 0x157   : > { %4236 = shalt.err (!%p4233_p8)
}
 0x158   : > { %3675 = dma.hbm_to_vmem [thread:$0]  (!%p5384_p7), %s4876_s13, 2048, %s4879_s4, %s622_s5, %s5381_s9, %s5381_s9, %s5380_s19  }
 0x159   : > { %s5391_s20 = sld [smem:[#allocation39_spill]] }
 0x15f   : > { %p5392_p13 = scmp.ne.s32.totalorder %s5391_s20, 0 }
 0x160   : > { %s5393_s22 = sld [smem:[#allocation37_spill]] (!%p5392_p13) }
 0x161   : > { %644 = sbr.rel (%p5392_p13) target bundleno = 3281 (0xcd1), region = 76 }
 0x166   : > { %p5394_p3 = scmp.eq.s32.totalorder (!%p5392_p13), %s5393_s22, 0 }
 0x168   : > { %4306 = dma.done.wait (%p5394_p3), [#allocation4], 128   ;;  %p5395_p6 = pmov %p5394_p3 }
 0x169   : > { %p5396_p9 = pmov %p5394_p3 }
 0x16a   : > { %4308 = vsyncadd (%p5395_p6), [#allocation4], 4294967168 }
 0x16b   : > { %4310 = dma.done.wait (%p5396_p9), [#allocation7], 256   ;;  %p5397_p11 = pmov %p5394_p3 }
 0x16c   : > { %p5398_p10 = pmov %p5394_p3 }
 0x16d   : > { %4312 = vsyncadd (%p5397_p11), [#allocation7], 4294967040 }
 0x16e   : > { %4314 = dma.done.wait (%p5398_p10), [#allocation10], 2176   ;;  %p5399_p7 = pmov %p5394_p3 }
 0x16f   : > { %s5400_s18 = sld [smem:[#allocation35_spill]]  ;;  %s5401_s15 = sld [smem:[#allocation38_spill]] }
 0x170   : > { %4316 = vsyncadd (%p5399_p7), [#allocation10], 4294965120  ;;  %s666_s19 = sand.u32 1, %s5393_s22  }
 0x171   : > { %s667_s24 = scalar_lea.sflag [#allocation13], %s666_s19 }
 0x175   : > { %s668_s9 = sand.u32 1, %s5400_s18   ;;  %p5402_p2 = scmp.ne.s32.totalorder %s5401_s15, 0 }
 0x176   : > { %s3239_s23 = sshll.u32 %s668_s9, 6 }
 0x177   : > { %s4924_s30 = scalar_lea.vmem [#allocation12], %s3239_s23 }
 0x178   : > { %4318 = dma.done.wait (%p5402_p2), %s667_s24, 2048  }
 0x179   : > { %4320 = vsyncadd (%p5402_p2), %s667_s24, 4294965248  ;;  %s4930_s13 = scalar_lea.vmem [#allocation14], %s3239_s23  ;;  %s685_s29 = scalar_lea.sflag [#allocation16], %s666_s19 }
 0x17a   : > { %s4932_s4 = scalar_lea.vmem [#allocation15], %s3239_s23 }
 0x17b   : > { %4322 = dma.done.wait (%p5402_p2), %s685_s29, 2048  }
 0x17c   : > { %4324 = vsyncadd (%p5402_p2), %s685_s29, 4294965248  ;;  %s3243_s5 = sshll.u32 %s668_s9, 7  ;;  %s4938_s25 = scalar_lea.vmem [#allocation17], %s3239_s23 }
 0x17d   : > { %s703_s28 = scalar_lea.sflag [#allocation19], %s666_s19  ;;  %s4940_s17 = scalar_lea.vmem [#allocation18], %s3243_s5 }
 0x17e   : > { %4326 = dma.done.wait (%p5402_p2), %s703_s28, 4096  }
 0x17f   : > { %4328 = vsyncadd (%p5402_p2), %s703_s28, 4294963200  ;;  %s4946_s3 = scalar_lea.vmem [#allocation20], %s3243_s5  ;;  %s721_s7 = scalar_lea.sflag [#allocation22], %s668_s9 }
 0x180   : > { %s4948_s21 = scalar_lea.vmem [#allocation21], %s3243_s5 }
 0x181   : > { %4330 = dma.done.wait (%p5402_p2), %s721_s7, 2048  }
 0x182   : > { %4332 = vsyncadd (%p5402_p2), %s721_s7, 4294965248  ;;  %p5403_p5 = scmp.ne.s32.totalorder %s5393_s22, 0 }
 0x183   : > { %v801_v0 = vld [vmem:[#allocation3] sm:$0xff] (!%p5403_p5) }
 0x184   : > { %800 = sbr.rel (%p5403_p5) target bundleno = 395 (0x18b), region = 128  ;;  %802 = vst [vmem:[#allocation2] sm:$0xff] (!%p5403_p5), %v801_v0 }
 0x18b PF: > { %v803_v1 = vld [vmem:[#allocation2] sm:$0xff]  ;;  %v4373_v3 = vmov 0.0   ;;  %v3744_v4 = vld [vmem:[%s4924_s30] sm:$0xff]   ;;  %v3746_v6 = vld [vmem:[%s4924_s30 + $0x8] sm:$0xff]   ;;  %vm4374_vm0 = vmmov 0   ;;  %s4375_s16 = smov 16  }
 0x18c   : > { %v807_v2 = vmul.f32 %v803_v1, %v803_v1  ;;  %3468 = vmatprep.subr.bf16.mxu0 %v4373_v3  ;;  %3488 = vmatprep.subr.bf16.mxu1 %v4373_v3  ;;  %v3745_v5 = vld [vmem:[%s4930_s13] sm:$0xff]   ;;  %v3747_v7 = vld [vmem:[%s4930_s13 + $0x8] sm:$0xff]   ;;  %v3748_v8 = vld [vmem:[%s4924_s30 + $0x10] sm:$0xff]   ;;  %s4376_s14 = smov 112   ;;  %s5404_s20 = sld [smem:[#allocation43_spill]]  ;;  %vm1596_vm1 = vcmask 261120  }
 0x18d   : > { %3469 = vmatpush3.bf16.msra.mxu0 %v3744_v4  ;;  %3489 = vmatpush3.bf16.msra.mxu1 %v3745_v5  ;;  %v3749_v9 = vld [vmem:[%s4930_s13 + $0x10] sm:$0xff]   ;;  %v3750_v10 = vld [vmem:[%s4924_s30 + $0x18] sm:$0xff]   ;;  %v3752_v12 = vld [vmem:[%s4924_s30 + $0x20] sm:$0xff]   ;;  %s4377_s22 = smov 96   ;;  %s4378_s18 = smov 64   ;;  %vm1790_vm2 = vcmask 64512  }
 0x18e   : > { %808 = vadd.xlane.f32.xlu0 %v807_v2  ;;  %3470 = vmatprep.subr.bf16.mxu0 %v4373_v3  ;;  %v3751_v11 = vld [vmem:[%s4930_s13 + $0x18] sm:$0xff]   ;;  %v3753_v13 = vld [vmem:[%s4930_s13 + $0x20] sm:$0xff]   ;;  %v3754_v14 = vld [vmem:[%s4924_s30 + $0x28] sm:$0xff]   ;;  %s4379_s15 = smov 32   ;;  %v4380_v63 = vmov 1983009808  }
 0x18f   : > { %3490 = vmatprep.subr.bf16.mxu1 %v4373_v3  ;;  %v3755_v15 = vld [vmem:[%s4930_s13 + $0x28] sm:$0xff]   ;;  %v3756_v16 = vld [vmem:[%s4924_s30 + $0x30] sm:$0xff]   ;;  %3484 = vmatprep.mubr.msk.bf16.mxu0 %vm4374_vm0, %v4373_v3  ;;  %v3758_v18 = vld [vmem:[%s4924_s30 + $0x38] sm:$0xff]   ;;  %v1159_v0 = vunpack.c.l.s4 %v4380_v63  ;;  %v4381_v4 = vmov 1934713408   ;;  %vm1842_vm3 = vcmask 1043456  }
 0x190   : > { %v3757_v17 = vld [vmem:[%s4930_s13 + $0x30] sm:$0xff]   ;;  %3504 = vmatprep.mubr.msk.bf16.mxu1 %vm4374_vm0, %v4373_v3  ;;  %v3759_v19 = vld [vmem:[%s4930_s13 + $0x38] sm:$0xff]   ;;  %v3760_v25 = vld [vmem:[%s4932_s4] sm:$0xff]   ;;  %v1191_v5 = vunpack.c.l.s4 %v4381_v4  ;;  %vm2173_vm4 = vcmask 523264   ;;  %vm2175_vm5 = vcmask 785408   ;;  %s5405_s19 = sld [smem:[#allocation37_spill]] }
 0x191   : > { %3471 = vmatpush3.bf16.msra.mxu0 %v3746_v6  ;;  %3491 = vmatpush3.bf16.msra.mxu1 %v3747_v7  ;;  %v3761_v27 = vld [vmem:[%s4932_s4 + $0x8] sm:$0xff]   ;;  %v3762_v28 = vld [vmem:[%s4932_s4 + $0x10] sm:$0xff]   ;;  %v3763_v29 = vld [vmem:[%s4932_s4 + $0x18] sm:$0xff]   ;;  %v1160_v6 = vunpack.c.0.s8 %v1159_v0 }
 0x192   : > { %3472 = vmatprep.subr.bf16.mxu0 %v4373_v3  ;;  %3492 = vmatprep.subr.bf16.mxu1 %v4373_v3  ;;  %v3764_v30 = vld [vmem:[%s4932_s4 + $0x20] sm:$0xff]   ;;  %v3765_v31 = vld [vmem:[%s4932_s4 + $0x28] sm:$0xff]   ;;  %v3766_v32 = vld [vmem:[%s4932_s4 + $0x30] sm:$0xff]  }
 0x193   : > { %v3767_v33 = vld [vmem:[%s4932_s4 + $0x38] sm:$0xff]   ;;  %v804_v46 = vld [vmem:[#allocation6] sm:$0xff]  ;;  %v805_v47 = vld [vmem:[#allocation8] sm:$0xff] }
 0x194   : > { %v806_v48 = vld [vmem:[%s5404_s20] sm:$0xff] }
 0x195   : > { %3473 = vmatpush3.bf16.msra.mxu0 %v3748_v8  ;;  %3493 = vmatpush3.bf16.msra.mxu1 %v3749_v9  ;;  %v1192_v9 = vunpack.c.0.s8 %v1191_v5 }
 0x196   : > { %3474 = vmatprep.subr.bf16.mxu0 %v4373_v3  ;;  %3494 = vmatprep.subr.bf16.mxu1 %v4373_v3  ;;  %p3345_p12 = scmp.ne.s32.totalorder %s5405_s19, 1 }
 0x197   : > { %s5406_s24 = sld [smem:[#allocation45_spill]] (!%p3345_p12) }
 0x199   : > { %3475 = vmatpush3.bf16.msra.mxu0 %v3750_v10  ;;  %3495 = vmatpush3.bf16.msra.mxu1 %v3751_v11 }
 0x19a   : > { %3476 = vmatprep.subr.bf16.mxu0 %v4373_v3  ;;  %3496 = vmatprep.subr.bf16.mxu1 %v4373_v3 }
 0x19d   : > { %3477 = vmatpush3.bf16.msra.mxu0 %v3752_v12  ;;  %3497 = vmatpush3.bf16.msra.mxu1 %v3753_v13 }
 0x19e   : > { %3478 = vmatprep.subr.bf16.mxu0 %v4373_v3  ;;  %3498 = vmatprep.subr.bf16.mxu1 %v4373_v3 }
 0x1a1   : > { %3479 = vmatpush3.bf16.msra.mxu0 %v3754_v14  ;;  %3499 = vmatpush3.bf16.msra.mxu1 %v3755_v15 }
 0x1a2   : > { %3480 = vmatprep.subr.bf16.mxu0 %v4373_v3  ;;  %3500 = vmatprep.subr.bf16.mxu1 %v4373_v3 }
 0x1a5   : > { %3481 = vmatpush3.bf16.msra.mxu0 %v3756_v16  ;;  %3501 = vmatpush3.bf16.msra.mxu1 %v3757_v17 }
 0x1a6   : > { %3482 = vmatprep.subr.bf16.mxu0 %v4373_v3  ;;  %3502 = vmatprep.subr.bf16.mxu1 %v4373_v3 }
 0x1a9   : > { %3483 = vmatpush3.bf16.msra.mxu0 %v3758_v18  ;;  %3503 = vmatpush3.bf16.msra.mxu1 %v3759_v19 }
 0x1aa   : > { %3508 = vmatprep.subr.bf16.mxu0 %v4373_v3  ;;  %3528 = vmatprep.subr.bf16.mxu1 %v4373_v3 }
 0x21b   : > { %v809_v20 = vpop.xlane.xlu0 %808 }
 0x21c   : > { %v811_v21 = vmul.f32 0.0078125, %v809_v20 }
 0x21e   : > { %v812_v22 = vadd.f32 1e-06, %v811_v21 }
 0x220   : > { %3840 = vrsqrt.f32 %v812_v22 }
 0x22a   : > { %v3841_v23 = vpop.eup %3840 }
 0x22b   : > { %v814_v24 = vmul.f32 %v3841_v23, %v803_v1  ;;  %v1161_v1 = vlaneseq }
 0x22d   : > { %v815_v26 = vpack.c.bf16 %v814_v24, %v814_v24  ;;  %v1162_v7 = vshrl.u32 %v1161_v1, 7 }
 0x22f   : > { %3485 = vmatmul.mubr.bf16.vlgmr.msra.gmra.mrb[0].mxu0 %v815_v26  ;;  %3505 = vmatmul.mubr.bf16.vlgmr.msra.gmra.mrb[0].mxu1 %v815_v26  ;;  %v5027_v10 = vsub.s32 %v1160_v6, %v1162_v7  ;;  %v5029_v16 = vsub.s32 %v1192_v9, %v1162_v7 }
 0x230   : > { %3509 = vmatpush3.bf16.msra.mxu0 %v3760_v25  ;;  %3524 = vmatprep.mubr.msk.bf16.mxu0 %vm4374_vm0, %v4373_v3 }
 0x231   : > { %3510 = vmatprep.subr.bf16.mxu0 %v4373_v3  ;;  %3530 = vmatprep.mubr.msk.bf16.mxu1 %vm4374_vm0, %v4373_v3 }
 0x234   : > { %3511 = vmatpush3.bf16.msra.mxu0 %v3761_v27 }
 0x235   : > { %3512 = vmatprep.subr.bf16.mxu0 %v4373_v3 }
 0x238   : > { %3513 = vmatpush3.bf16.msra.mxu0 %v3762_v28 }
 0x239   : > { %3514 = vmatprep.subr.bf16.mxu0 %v4373_v3 }
 0x23c   : > { %3515 = vmatpush3.bf16.msra.mxu0 %v3763_v29 }
 0x23d   : > { %3516 = vmatprep.subr.bf16.mxu0 %v4373_v3 }
 0x240   : > { %3517 = vmatpush3.bf16.msra.mxu0 %v3764_v30 }
 0x241   : > { %3518 = vmatprep.subr.bf16.mxu0 %v4373_v3 }
 0x244   : > { %3519 = vmatpush3.bf16.msra.mxu0 %v3765_v31 }
 0x245   : > { %3520 = vmatprep.subr.bf16.mxu0 %v4373_v3 }
 0x248   : > { %3521 = vmatpush3.bf16.msra.mxu0 %v3766_v32 }
 0x249   : > { %3522 = vmatprep.subr.bf16.mxu0 %v4373_v3 }
 0x24c   : > { %3523 = vmatpush3.bf16.msra.mxu0 %v3767_v33 }
 0x24d   : > { %3552 = vmatprep.subr.bf16.mxu0 %v4373_v3 }
 0x24f   : > { %3525 = vmatmul.mubr.bf16.vlgmr.msra.gmra.mrb[4].mxu0 %v815_v26 }
 0x250   : > { %3554 = vmatprep.mubr.msk.bf16.mxu0 %vm4374_vm0, %v4373_v3 }
 0x302   : > { %v914_v34 = vpop.f32.mrb[0].mxu0  ;;  %v1018_v35 = vpop.f32.mrb[0].mxu1 }
 0x303   : > { %1142 = vrot.lane.b32.xlu1 %v1018_v35, %s4375_s16  ;;  %1138 = vrot.lane.b32.xlu0 %v1018_v35, %s4376_s14  ;;  %v3486_v36 = vpop.f32.mrb[1].mxu0  ;;  %v3506_v37 = vpop.f32.mrb[1].mxu1  ;;  %v1137_v51 = vmul.f32 %v1018_v35, %v804_v46  ;;  %v1128_v58 = vmul.f32 %v914_v34, %v804_v46 }
 0x304   : > { %v917_v38 = vpop.f32.mrb[2].mxu0  ;;  %v1021_v39 = vpop.f32.mrb[2].mxu1 }
 0x305   : > { %v3487_v40 = vpop.f32.mrb[3].mxu0  ;;  %v3507_v41 = vpop.f32.mrb[3].mxu1 }
 0x307   : > { %1129 = vrot.lane.b32.xlu1 %v914_v34, %s4376_s14 }
 0x30b   : > { %1133 = vrot.lane.b32.xlu1 %v914_v34, %s4375_s16 }
 0x322   : > { %v5016_v42 = vpop.f32.mrb[4].mxu0 }
 0x323   : > { %v3526_v43 = vpop.f32.mrb[5].mxu0 }
 0x324   : > { %v1125_v44 = vpop.f32.mrb[6].mxu0 }
 0x325   : > { %v3527_v45 = vpop.f32.mrb[7].mxu0 }
 0x375   : > { %v1143_v49 = vpop.permute.xlu1 %1142  ;;  %v1139_v50 = vpop.permute.xlu0 %1138 }
 0x376   : > { %v1140_v52 = vmul.f32 %v1139_v50, %v805_v47  ;;  %v1144_v53 = vmul.f32 %v1143_v49, %v806_v48 }
 0x378   : > { %v1141_v54 = vadd.f32 %v1140_v52, %v1137_v51 }
 0x379   : > { %v1130_v55 = vpop.permute.xlu1 %1129 }
 0x37a   : > { %v1145_v56 = vadd.f32 %v1144_v53, %v1141_v54  ;;  %v1131_v57 = vmul.f32 %v1130_v55, %v805_v47 }
 0x37c   : > { %1297 = vrot.lane.b32.xlu1 %v1145_v56, %s4377_s22  ;;  %v1132_v60 = vadd.f32 %v1131_v57, %v1128_v58 }
 0x37d   : > { %v1134_v59 = vpop.permute.xlu1 %1133 }
 0x37e   : > { %v1135_v61 = vmul.f32 %v1134_v59, %v806_v48 }
 0x380   : > { %v1136_v62 = vadd.f32 %v1135_v61, %v1132_v60  ;;  %1300 = vrot.lane.b32.xlu1 %v1145_v56, %s4378_s18 }
 0x382   : > { %1150 = vrot.lane.b32.xlu0 %v1136_v62, %s4378_s18 }
 0x384   : > { %1303 = vrot.lane.b32.xlu1 %v1145_v56, %s4379_s15 }
 0x388   : > { %1147 = vrot.lane.b32.xlu1 %v1136_v62, %s4377_s22 }
 0x38c   : > { %1153 = vrot.lane.b32.xlu1 %v1136_v62, %s4379_s15 }
 0x3ee   : > { %v1298_v2 = vpop.permute.xlu1 %1297 }
 0x3f2   : > { %v1301_v8 = vpop.permute.xlu1 %1300 }
 0x3f3   : > { %v1306_v11 = vcombine.low %v1145_v56, %v1301_v8  ;;  %v1307_v12 = vcombine.high %v1145_v56, %v1301_v8 }
 0x3f4   : > { %v1151_v22 = vpop.permute.xlu0 %1150 }
 0x3f5   : > { %v1314_v17 = vrot.slane %v1306_v11, %v5027_v10  ;;  %v1321_v18 = vrot.slane %v1307_v12, %v5027_v10  ;;  %v1156_v31 = vcombine.low %v1136_v62, %v1151_v22  ;;  %v1157_v32 = vcombine.high %v1136_v62, %v1151_v22 }
 0x3f6   : > { %v1304_v13 = vpop.permute.xlu1 %1303 }
 0x3f7   : > { %v1322_v14 = vcombine.low %v1298_v2, %v1304_v13  ;;  %v1323_v15 = vcombine.high %v1298_v2, %v1304_v13  ;;  %v1164_v45 = vrot.slane %v1156_v31, %v5027_v10  ;;  %v1171_v46 = vrot.slane %v1157_v32, %v5027_v10 }
 0x3f9   : > { %v1330_v19 = vrot.slane %v1322_v14, %v5027_v10  ;;  %v1337_v20 = vrot.slane %v1323_v15, %v5027_v10 }
 0x3fa   : > { %v1148_v21 = vpop.permute.xlu1 %1147 }
 0x3fb   : > { %v1338_v23 = vcombine.low %v1314_v17, %v1330_v19  ;;  %v1339_v24 = vcombine.high %v1314_v17, %v1330_v19  ;;  %v1354_v25 = vcombine.low %v1321_v18, %v1337_v20  ;;  %v1355_v26 = vcombine.high %v1321_v18, %v1337_v20 }
 0x3fd   : > { %v1346_v27 = vrot.slane %v1338_v23, %v5029_v16  ;;  %v1353_v28 = vrot.slane %v1339_v24, %v5029_v16  ;;  %v1362_v29 = vrot.slane %v1354_v25, %v5029_v16  ;;  %v1369_v30 = vrot.slane %v1355_v26, %v5029_v16 }
 0x3fe   : > { %v1154_v33 = vpop.permute.xlu1 %1153 }
 0x3ff   : > { %v1374_v34 = vcombine.low %v1346_v27, %v1353_v28  ;;  %v3273_v35 = vcombine.high %v1346_v27, %v1353_v28  ;;  %v1390_v36 = vcombine.low %v1362_v29, %v1369_v30  ;;  %v3274_v37 = vcombine.high %v1362_v29, %v1369_v30 }
 0x400   : > { %v1172_v38 = vcombine.low %v1148_v21, %v1154_v33  ;;  %v1173_v39 = vcombine.high %v1148_v21, %v1154_v33 }
 0x401   : > { %v1381_v40 = vrot.slane %v1374_v34, %v5027_v10  ;;  %v1389_v41 = vrot.slane %v3273_v35, %v5027_v10  ;;  %v1397_v43 = vrot.slane %v1390_v36, %v5027_v10  ;;  %v1405_v44 = vrot.slane %v3274_v37, %v5027_v10 }
 0x402   : > { %v1180_v47 = vrot.slane %v1172_v38, %v5027_v10  ;;  %v1187_v48 = vrot.slane %v1173_v39, %v5027_v10 }
 0x403   : > { %v1406_v49 = vcombine.low %v1381_v40, %v1389_v41  ;;  %v1422_v50 = vcombine.low %v1397_v43, %v1405_v44  ;;  %v1407_v9 = vcombine.high %v1381_v40, %v1389_v41  ;;  %v1423_v14 = vcombine.high %v1397_v43, %v1405_v44  ;;  %v1785_v41 = vld [vmem:[#allocation9] sm:$0xff] }
 0x404   : > { %v1188_v51 = vcombine.low %v1164_v45, %v1180_v47  ;;  %v1189_v52 = vcombine.high %v1164_v45, %v1180_v47  ;;  %v1204_v53 = vcombine.low %v1171_v46, %v1187_v48  ;;  %v1205_v54 = vcombine.high %v1171_v46, %v1187_v48 }
 0x405   : > { %v1414_v55 = vrot.slane %v1406_v49, %v5029_v16  ;;  %v1430_v56 = vrot.slane %v1422_v50, %v5029_v16  ;;  %v1421_v20 = vrot.slane %v1407_v9, %v5029_v16  ;;  %v1437_v21 = vrot.slane %v1423_v14, %v5029_v16 }
 0x406   : > { %v1196_v57 = vrot.slane %v1188_v51, %v5029_v16  ;;  %v1203_v58 = vrot.slane %v1189_v52, %v5029_v16  ;;  %v1212_v59 = vrot.slane %v1204_v53, %v5029_v16  ;;  %v1219_v60 = vrot.slane %v1205_v54, %v5029_v16 }
 0x407   : > { %v1438_v61 = vcombine.low %v1414_v55, %v1430_v56  ;;  %v1439_v13 = vcombine.high %v1414_v55, %v1430_v56  ;;  %v1440_v24 = vcombine.low %v1421_v20, %v1437_v21  ;;  %v1441_v33 = vcombine.high %v1421_v20, %v1437_v21 }
 0x408   : > { %v1224_v62 = vcombine.low %v1196_v57, %v1203_v58  ;;  %v3271_v63 = vcombine.high %v1196_v57, %v1203_v58  ;;  %v1240_v0 = vcombine.low %v1212_v59, %v1219_v60  ;;  %v3272_v1 = vcombine.high %v1212_v59, %v1219_v60 }
 0x409   : > { %v1442_v2 = vpack.c.bf16 %v1438_v61, %v1438_v61  ;;  %v1443_v19 = vpack.c.bf16 %v1439_v13, %v1439_v13  ;;  %v1444_v28 = vpack.c.bf16 %v1440_v24, %v1440_v24  ;;  %v1445_v35 = vpack.c.bf16 %v1441_v33, %v1441_v33 }
 0x40a   : > { %v1231_v4 = vrot.slane %v1224_v62, %v5027_v10  ;;  %v1239_v5 = vrot.slane %v3271_v63, %v5027_v10  ;;  %v1247_v6 = vrot.slane %v1240_v0, %v5027_v10  ;;  %v1255_v7 = vrot.slane %v3272_v1, %v5027_v10 }
 0x40b   : > { %v1601_v8 = vsel %vm1596_vm1, %v1442_v2, 0  ;;  %v1647_v23 = vsel %vm1596_vm1, %v1443_v19, 0  ;;  %v1693_v32 = vsel %vm1596_vm1, %v1444_v28, 0  ;;  %v1739_v37 = vsel %vm1596_vm1, %v1445_v35, 0 }
 0x40c   : > { %v1256_v11 = vcombine.low %v1231_v4, %v1239_v5  ;;  %v1272_v12 = vcombine.low %v1247_v6, %v1255_v7  ;;  %3529 = vmatpush3.bf16.xpose.msra.mxu1 %v1601_v8  ;;  %v1257_v25 = vcombine.high %v1231_v4, %v1239_v5  ;;  %v1273_v26 = vcombine.high %v1247_v6, %v1255_v7 }
 0x40d   : > { %3534 = vmatprep.subr.bf16.mxu1 %v4373_v3 }
 0x40e   : > { %v1264_v15 = vrot.slane %v1256_v11, %v5029_v16  ;;  %v1280_v17 = vrot.slane %v1272_v12, %v5029_v16  ;;  %v1271_v30 = vrot.slane %v1257_v25, %v5029_v16  ;;  %v1287_v31 = vrot.slane %v1273_v26, %v5029_v16 }
 0x410   : > { %v1288_v18 = vcombine.low %v1264_v15, %v1280_v17  ;;  %v1289_v27 = vcombine.high %v1264_v15, %v1280_v17  ;;  %v1290_v34 = vcombine.low %v1271_v30, %v1287_v31  ;;  %v1291_v38 = vcombine.high %v1271_v30, %v1287_v31 }
 0x412   : > { %v1292_v22 = vpack.c.bf16 %v1288_v18, %v1288_v18  ;;  %v1293_v29 = vpack.c.bf16 %v1289_v27, %v1289_v27  ;;  %v1294_v36 = vpack.c.bf16 %v1290_v34, %v1290_v34  ;;  %v1295_v39 = vpack.c.bf16 %v1291_v38, %v1291_v38 }
 0x414   : > { %3531 = vmatmul.mubr.msk.bf16.vlgmr.msra.gmra.mrb[4].mxu1 %vm1596_vm1, %v1292_v22 }
 0x415   : > { %3535 = vmatpush3.bf16.xpose.msra.mxu1 %v1647_v23  ;;  %3536 = vmatprep.mubr.msk.bf16.mxu1 %vm4374_vm0, %v4373_v3 }
 0x416   : > { %3540 = vmatprep.subr.bf16.mxu1 %v4373_v3 }
 0x41c   : > { %3537 = vmatmul.mubr.msk.bf16.vlgmr.msra.gmra.mrb[8].mxu1 %vm1596_vm1, %v1293_v29 }
 0x41d   : > { %3541 = vmatpush3.bf16.xpose.msra.mxu1 %v1693_v32  ;;  %3542 = vmatprep.mubr.msk.bf16.mxu1 %vm4374_vm0, %v4373_v3 }
 0x41e   : > { %3546 = vmatprep.subr.bf16.mxu1 %v4373_v3 }
 0x424   : > { %3543 = vmatmul.mubr.msk.bf16.vlgmr.msra.gmra.mrb[12].mxu1 %vm1596_vm1, %v1294_v36 }
 0x425   : > { %3547 = vmatpush3.bf16.xpose.msra.mxu1 %v1739_v37  ;;  %3548 = vmatprep.mubr.msk.bf16.mxu1 %vm4374_vm0, %v4373_v3 }
 0x426   : > { %3558 = vmatprep.subr.bf16.mxu1 %v4373_v3 }
 0x42c   : > { %3549 = vmatmul.mubr.msk.bf16.vlgmr.msra.gmra.mrb[16].mxu1 %vm1596_vm1, %v1295_v39 }
 0x42d   : > { %3560 = vmatprep.mubr.msk.bf16.mxu1 %vm4374_vm0, %v4373_v3 }
 0x4e7   : > { %v1637_v40 = vpop.f32.mrb[4].mxu1 }
 0x4e8   : > { %v1781_v43 = vmul.f32 0.17677669, %v1637_v40  ;;  %v3532_v44 = vpop.f32.mrb[5].mxu1 }
 0x4e9   : > { %v1640_v45 = vpop.f32.mrb[6].mxu1 }
 0x4ea   : > { %v3533_v46 = vpop.f32.mrb[7].mxu1  ;;  %v1786_v47 = vadd.f32 %v1785_v41, %v1781_v43 }
 0x4ec   : > { %v1791_v48 = vsel %vm1790_vm2, %v1786_v47, -inf }
 0x4ed   : > { %1792 = vmax.xlane.f32.xlu0 %v1791_v48 }
 0x4ef   : > { %v1683_v49 = vpop.f32.mrb[8].mxu1 }
 0x4f0   : > { %v1782_v50 = vmul.f32 0.17677669, %v1683_v49  ;;  %v3538_v51 = vpop.f32.mrb[9].mxu1 }
 0x4f1   : > { %v1686_v52 = vpop.f32.mrb[10].mxu1 }
 0x4f2   : > { %v3539_v53 = vpop.f32.mrb[11].mxu1  ;;  %v1787_v54 = vadd.f32 %v1785_v41, %v1782_v50 }
 0x4f4   : > { %v1794_v55 = vsel %vm1790_vm2, %v1787_v54, -inf }
 0x4f5   : > { %1795 = vmax.xlane.f32.xlu1 %v1794_v55 }
 0x4f7   : > { %v1729_v56 = vpop.f32.mrb[12].mxu1 }
 0x4f8   : > { %v1783_v57 = vmul.f32 0.17677669, %v1729_v56  ;;  %v3544_v58 = vpop.f32.mrb[13].mxu1 }
 0x4f9   : > { %v1732_v59 = vpop.f32.mrb[14].mxu1 }
 0x4fa   : > { %v3545_v60 = vpop.f32.mrb[15].mxu1  ;;  %v1788_v61 = vadd.f32 %v1785_v41, %v1783_v57 }
 0x4fc   : > { %v1797_v62 = vsel %vm1790_vm2, %v1788_v61, -inf }
 0x4fd   : > { %1798 = vmax.xlane.f32.xlu0 %v1797_v62 }
 0x4ff   : > { %v1775_v63 = vpop.f32.mrb[16].mxu1 }
 0x500   : > { %v1784_v0 = vmul.f32 0.17677669, %v1775_v63  ;;  %v3550_v1 = vpop.f32.mrb[17].mxu1 }
 0x501   : > { %v1778_v2 = vpop.f32.mrb[18].mxu1 }
 0x502   : > { %v3551_v4 = vpop.f32.mrb[19].mxu1  ;;  %v1789_v5 = vadd.f32 %v1785_v41, %v1784_v0 }
 0x504   : > { %v1800_v6 = vsel %vm1790_vm2, %v1789_v5, -inf }
 0x505   : > { %1801 = vmax.xlane.f32.xlu0 %v1800_v6 }
 0x506   : > { %1447 = vrot.lane.b32.xlu1 %v5016_v42, %s4377_s22 }
 0x57a   : > { %v1793_v7 = vpop.xlane.xlu0 %1792 }
 0x57b   : > { %v1803_v8 = vsub.f32 %v1786_v47, %v1793_v7 }
 0x57d   : > { %v1807_v9 = vmul.f32 1.442695, %v1803_v8 }
 0x57f   : > { %3842 = vpow2.f32 %v1807_v9 }
 0x582   : > { %v1796_v11 = vpop.xlane.xlu1 %1795 }
 0x583   : > { %v1804_v12 = vsub.f32 %v1787_v54, %v1796_v11 }
 0x585   : > { %v1809_v13 = vmul.f32 1.442695, %v1804_v12 }
 0x586   : > { %v1448_v29 = vpop.permute.xlu1 %1447 }
 0x587   : > { %3844 = vpow2.f32 %v1809_v13 }
 0x589   : > { %v5089_v14 = vpop.eup %3842 }
 0x58a   : > { %v1815_v15 = vsel %vm1790_vm2, %v5089_v14, 0.0  ;;  %v1799_v19 = vpop.xlane.xlu0 %1798 }
 0x58b   : > { %1816 = vadd.xlane.f32.xlu1 %v1815_v15  ;;  %v1805_v20 = vsub.f32 %v1788_v61, %v1799_v19 }
 0x58d   : > { %v1811_v21 = vmul.f32 1.442695, %v1805_v20 }
 0x58f   : > { %3846 = vpow2.f32 %v1811_v21 }
 0x591   : > { %v5093_v17 = vpop.eup %3844 }
 0x592   : > { %v1818_v18 = vsel %vm1790_vm2, %v5093_v17, 0.0  ;;  %v1802_v22 = vpop.xlane.xlu0 %1801 }
 0x593   : > { %1819 = vadd.xlane.f32.xlu0 %v1818_v18  ;;  %v1806_v23 = vsub.f32 %v1789_v5, %v1802_v22 }
 0x595   : > { %v1813_v24 = vmul.f32 1.442695, %v1806_v23 }
 0x597   : > { %3848 = vpow2.f32 %v1813_v24 }
 0x599   : > { %v5101_v25 = vpop.eup %3846 }
 0x59a   : > { %v1821_v26 = vsel %vm1790_vm2, %v5101_v25, 0.0 }
 0x59c   : > { %1453 = vrot.lane.b32.xlu1 %v5016_v42, %s4379_s15 }
 0x5a1   : > { %v5105_v27 = vpop.eup %3848 }
 0x5a2   : > { %v1824_v28 = vsel %vm1790_vm2, %v5105_v27, 0.0 }
 0x5a9   : > { %1450 = vrot.lane.b32.xlu0 %v5016_v42, %s4378_s18 }
 0x5c0   : > { %1822 = vadd.xlane.f32.xlu1 %v1821_v26 }
 0x5c8   : > { %1825 = vadd.xlane.f32.xlu0 %v1824_v28 }
 0x618   : > { %v1817_v30 = vpop.xlane.xlu1 %1816 }
 0x619   : > { %3850 = vrcp.f32 %v1817_v30 }
 0x61c   : > { %v1454_v31 = vpop.permute.xlu1 %1453 }
 0x61d   : > { %v1472_v33 = vcombine.low %v1448_v29, %v1454_v31  ;;  %v1473_v34 = vcombine.high %v1448_v29, %v1454_v31 }
 0x61f   : > { %v1480_v38 = vrot.slane %v1472_v33, %v5027_v10  ;;  %v1487_v39 = vrot.slane %v1473_v34, %v5027_v10  ;;  %v3768_v33 = vld [vmem:[%s4938_s25] sm:$0xff]   ;;  %v3769_v34 = vld [vmem:[%s4938_s25 + $0x8] sm:$0xff]  }
 0x620   : > { %v1820_v32 = vpop.xlane.xlu0 %1819 }
 0x621   : > { %3852 = vrcp.f32 %v1820_v32 }
 0x623   : > { %v3851_v62 = vpop.eup %3850 }
 0x624   : > { %v1451_v35 = vpop.permute.xlu0 %1450  ;;  %v1831_v9 = vmul.f32 %v3851_v62, %v5089_v14 }
 0x625   : > { %v1456_v36 = vcombine.low %v5016_v42, %v1451_v35  ;;  %v1457_v37 = vcombine.high %v5016_v42, %v1451_v35  ;;  %v3771_v35 = vld [vmem:[%s4938_s25 + $0x18] sm:$0xff]  }
 0x626   : > { %v1835_v21 = vpack.c.bf16 %v1831_v9, %v1831_v9 }
 0x627   : > { %v1464_v40 = vrot.slane %v1456_v36, %v5027_v10  ;;  %v1471_v41 = vrot.slane %v1457_v37, %v5027_v10  ;;  %v3772_v36 = vld [vmem:[%s4938_s25 + $0x20] sm:$0xff]  }
 0x629   : > { %v1488_v43 = vcombine.low %v1464_v40, %v1480_v38  ;;  %v1489_v44 = vcombine.high %v1464_v40, %v1480_v38  ;;  %v1504_v45 = vcombine.low %v1471_v41, %v1487_v39  ;;  %v1505_v46 = vcombine.high %v1471_v41, %v1487_v39 }
 0x62b   : > { %v1496_v47 = vrot.slane %v1488_v43, %v5029_v16  ;;  %v1503_v48 = vrot.slane %v1489_v44, %v5029_v16  ;;  %v1512_v42 = vrot.slane %v1504_v45, %v5029_v16  ;;  %v1519_v49 = vrot.slane %v1505_v46, %v5029_v16  ;;  %v3853_v4 = vpop.eup %3852 }
 0x62c   : > { %v1832_v11 = vmul.f32 %v3853_v4, %v5093_v17 }
 0x62d   : > { %v1524_v50 = vcombine.low %v1496_v47, %v1503_v48  ;;  %v3275_v51 = vcombine.high %v1496_v47, %v1503_v48  ;;  %v1540_v52 = vcombine.low %v1512_v42, %v1519_v49  ;;  %v3276_v53 = vcombine.high %v1512_v42, %v1519_v49 }
 0x62e   : > { %v1836_v22 = vpack.c.bf16 %v1832_v11, %v1832_v11 }
 0x62f   : > { %v1531_v54 = vrot.slane %v1524_v50, %v5027_v10  ;;  %v1539_v55 = vrot.slane %v3275_v51, %v5027_v10  ;;  %v1547_v56 = vrot.slane %v1540_v52, %v5027_v10  ;;  %v1555_v57 = vrot.slane %v3276_v53, %v5027_v10 }
 0x631   : > { %v1556_v58 = vcombine.low %v1531_v54, %v1539_v55  ;;  %v1572_v59 = vcombine.low %v1547_v56, %v1555_v57  ;;  %v1557_v60 = vcombine.high %v1531_v54, %v1539_v55  ;;  %v1573_v61 = vcombine.high %v1547_v56, %v1555_v57 }
 0x633   : > { %v1564_v63 = vrot.slane %v1556_v58, %v5029_v16  ;;  %v1580_v0 = vrot.slane %v1572_v59, %v5029_v16  ;;  %v1571_v1 = vrot.slane %v1557_v60, %v5029_v16  ;;  %v1587_v2 = vrot.slane %v1573_v61, %v5029_v16  ;;  %v3774_v61 = vld [vmem:[%s4938_s25 + $0x30] sm:$0xff]  }
 0x635   : > { %v1588_v5 = vcombine.low %v1564_v63, %v1580_v0  ;;  %v1589_v6 = vcombine.high %v1564_v63, %v1580_v0  ;;  %v1590_v7 = vcombine.low %v1571_v1, %v1587_v2  ;;  %v1591_v8 = vcombine.high %v1571_v1, %v1587_v2 }
 0x637   : > { %v1592_v12 = vpack.c.bf16 %v1588_v5, %v1588_v5  ;;  %v1593_v13 = vpack.c.bf16 %v1589_v6, %v1589_v6  ;;  %v1594_v19 = vpack.c.bf16 %v1590_v7, %v1590_v7  ;;  %v1595_v20 = vpack.c.bf16 %v1591_v8, %v1591_v8  ;;  %v3775_v7 = vld [vmem:[%s4938_s25 + $0x38] sm:$0xff]  }
 0x639   : > { %v1844_v15 = vsel %vm1842_vm3, %v1592_v12, 0  ;;  %v1890_v18 = vsel %vm1842_vm3, %v1593_v13, 0  ;;  %v1936_v14 = vsel %vm1842_vm3, %v1594_v19, 0  ;;  %v1982_v17 = vsel %vm1842_vm3, %v1595_v20, 0 }
 0x63a   : > { %3553 = vmatpush3.bf16.msra.mxu0 %v1844_v15  ;;  %3559 = vmatpush3.bf16.msra.mxu1 %v1890_v18 }
 0x63b   : > { %3564 = vmatprep.subr.bf16.mxu0 %v4373_v3  ;;  %3570 = vmatprep.subr.bf16.mxu1 %v4373_v3 }
 0x63d   : > { %3555 = vmatmul.mubr.msk.bf16.vlgmr.msra.gmra.mrb[8].mxu0 %vm1790_vm2, %v1835_v21  ;;  %3561 = vmatmul.mubr.msk.bf16.vlgmr.msra.gmra.mrb[20].mxu1 %vm1790_vm2, %v1836_v22 }
 0x63e   : > { %3565 = vmatpush3.bf16.msra.mxu0 %v1936_v14  ;;  %3571 = vmatpush3.bf16.msra.mxu1 %v1982_v17 }
 0x63f   : > { %3566 = vmatprep.mubr.msk.bf16.mxu0 %vm4374_vm0, %v4373_v3  ;;  %3572 = vmatprep.mubr.msk.bf16.mxu1 %vm4374_vm0, %v4373_v3 }
 0x640   : > { %3576 = vmatprep.subr.bf16.mxu0 %v4373_v3 }
 0x64d   : > { %v1823_v23 = vpop.xlane.xlu1 %1822 }
 0x64e   : > { %3854 = vrcp.f32 %v1823_v23 }
 0x655   : > { %v1826_v24 = vpop.xlane.xlu0 %1825 }
 0x656   : > { %3856 = vrcp.f32 %v1826_v24 }
 0x658   : > { %v3855_v26 = vpop.eup %3854 }
 0x659   : > { %v1833_v28 = vmul.f32 %v3855_v26, %v5101_v25  ;;  %v3770_v25 = vld [vmem:[%s4938_s25 + $0x10] sm:$0xff]  }
 0x65b   : > { %v1837_v29 = vpack.c.bf16 %v1833_v28, %v1833_v28 }
 0x65d   : > { %3567 = vmatmul.mubr.msk.bf16.vlgmr.msra.gmra.mrb[12].mxu0 %vm1790_vm2, %v1837_v29 }
 0x65e   : > { %3592 = vmatprep.mubr.msk.bf16.mxu0 %vm4374_vm0, %v4373_v3  ;;  %3577 = vmatpush3.bf16.msra.mxu0 %v3768_v33 }
 0x65f   : > { %3578 = vmatprep.subr.bf16.mxu0 %v4373_v3 }
 0x660   : > { %v3857_v30 = vpop.eup %3856 }
 0x661   : > { %v1834_v31 = vmul.f32 %v3857_v30, %v5105_v27  ;;  %v3773_v27 = vld [vmem:[%s4938_s25 + $0x28] sm:$0xff]  }
 0x662   : > { %3579 = vmatpush3.bf16.msra.mxu0 %v3769_v34 }
 0x663   : > { %v1838_v32 = vpack.c.bf16 %v1834_v31, %v1834_v31  ;;  %3580 = vmatprep.subr.bf16.mxu0 %v4373_v3 }
 0x665   : > { %3573 = vmatmul.mubr.msk.bf16.vlgmr.msra.gmra.mrb[24].mxu1 %vm1790_vm2, %v1838_v32 }
 0x666   : > { %3581 = vmatpush3.bf16.msra.mxu0 %v3770_v25 }
 0x667   : > { %3582 = vmatprep.subr.bf16.mxu0 %v4373_v3 }
 0x66a   : > { %3583 = vmatpush3.bf16.msra.mxu0 %v3771_v35  ;;  %v3776_v35 = vld [vmem:[%s4940_s17] ss:$8 sps:$4 sm:$0xff]  }
 0x66b   : > { %3584 = vmatprep.subr.bf16.mxu0 %v4373_v3 }
 0x66e   : > { %3585 = vmatpush3.bf16.msra.mxu0 %v3772_v36  ;;  %v3778_v36 = vld [vmem:[%s4940_s17 + $0x4] ss:$8 sps:$4 sm:$0xff]  }
 0x66f   : > { %3586 = vmatprep.subr.bf16.mxu0 %v4373_v3  ;;  %2387 = vmatprep.subr.bf16.mxu1 %v3778_v36 }
 0x670   : > { %2388 = vmatpush1.bf16.msra.mxu1 %v3776_v35 }
 0x672   : > { %3587 = vmatpush3.bf16.msra.mxu0 %v3773_v27  ;;  %v3779_v27 = vld [vmem:[%s4946_s3] ss:$8 sps:$4 sm:$0xff]  }
 0x673   : > { %3588 = vmatprep.subr.bf16.mxu0 %v4373_v3 }
 0x676   : > { %3589 = vmatpush3.bf16.msra.mxu0 %v3774_v61  ;;  %v3806_v61 = vld [vmem:[%s4940_s17 + $0x50] ss:$8 sps:$4 sm:$0xff]  }
 0x677   : > { %3590 = vmatprep.subr.bf16.mxu0 %v4373_v3 }
 0x67a   : > { %3591 = vmatpush3.bf16.msra.mxu0 %v3775_v7  ;;  %v3823_v7 = vld [vmem:[%s4946_s3 + $0x74] ss:$8 sps:$4 sm:$0xff]  }
 0x710   : > { %v1880_v37 = vpop.f32.mrb[8].mxu0  ;;  %v1926_v38 = vpop.f32.mrb[20].mxu1 }
 0x711   : > { %v3556_v39 = vpop.f32.mrb[9].mxu0  ;;  %v3562_v40 = vpop.f32.mrb[21].mxu1 }
 0x712   : > { %v1883_v41 = vpop.f32.mrb[10].mxu0  ;;  %v1929_v43 = vpop.f32.mrb[22].mxu1  ;;  %v3787_v39 = vld [vmem:[%s4946_s3 + $0x14] ss:$8 sps:$4 sm:$0xff]   ;;  %v3782_v40 = vld [vmem:[%s4940_s17 + $0x10] ss:$8 sps:$4 sm:$0xff]  }
 0x713   : > { %v3557_v44 = vpop.f32.mrb[11].mxu0  ;;  %v3563_v45 = vpop.f32.mrb[23].mxu1  ;;  %v3785_v41 = vld [vmem:[%s4946_s3 + $0x10] ss:$8 sps:$4 sm:$0xff]   ;;  %v3790_v43 = vld [vmem:[%s4940_s17 + $0x24] ss:$8 sps:$4 sm:$0xff]  }
 0x714   : > { %v3793_v44 = vld [vmem:[%s4946_s3 + $0x24] ss:$8 sps:$4 sm:$0xff]   ;;  %v3788_v45 = vld [vmem:[%s4940_s17 + $0x20] ss:$8 sps:$4 sm:$0xff]  }
 0x730   : > { %v1972_v46 = vpop.f32.mrb[12].mxu0 }
 0x731   : > { %v2024_v47 = vcombine.low %v1880_v37, %v1972_v46  ;;  %v2025_v48 = vcombine.high %v1880_v37, %v1972_v46  ;;  %v3568_v42 = vpop.f32.mrb[13].mxu0  ;;  %v3781_v37 = vld [vmem:[%s4946_s3 + $0x4] ss:$8 sps:$4 sm:$0xff]   ;;  %v3791_v46 = vld [vmem:[%s4946_s3 + $0x20] ss:$8 sps:$4 sm:$0xff]  }
 0x732   : > { %v1975_v49 = vpop.f32.mrb[14].mxu0  ;;  %2524 = vmatprep.subr.bf16.mxu0 %v3781_v37  ;;  %v3794_v42 = vld [vmem:[%s4940_s17 + $0x30] ss:$8 sps:$4 sm:$0xff]  }
 0x733   : > { %v3569_v50 = vpop.f32.mrb[15].mxu0  ;;  %v2032_v56 = vrot.slane %v2024_v47, %v5027_v10  ;;  %v2039_v57 = vrot.slane %v2025_v48, %v5027_v10  ;;  %v3796_v47 = vld [vmem:[%s4940_s17 + $0x34] ss:$8 sps:$4 sm:$0xff]   ;;  %v3797_v49 = vld [vmem:[%s4946_s3 + $0x30] ss:$8 sps:$4 sm:$0xff]  }
 0x734   : > { %v3799_v48 = vld [vmem:[%s4946_s3 + $0x34] ss:$8 sps:$4 sm:$0xff]  }
 0x738   : > { %v2018_v51 = vpop.f32.mrb[24].mxu1 }
 0x739   : > { %v2040_v52 = vcombine.low %v1926_v38, %v2018_v51  ;;  %v2041_v53 = vcombine.high %v1926_v38, %v2018_v51  ;;  %v3574_v54 = vpop.f32.mrb[25].mxu1  ;;  %v3784_v38 = vld [vmem:[%s4940_s17 + $0x14] ss:$8 sps:$4 sm:$0xff]  }
 0x73a   : > { %v2021_v55 = vpop.f32.mrb[26].mxu1  ;;  %2389 = vmatprep.subr.bf16.mxu1 %v3784_v38  ;;  %v3868_v51 = vld [vmem:[#allocation2] sm:$0xff] }
 0x73b   : > { %v2048_v58 = vrot.slane %v2040_v52, %v5027_v10  ;;  %v2055_v59 = vrot.slane %v2041_v53, %v5027_v10  ;;  %v3575_v60 = vpop.f32.mrb[27].mxu1  ;;  %2390 = vmatpush1.bf16.msra.mxu1 %v3782_v40 }
 0x73c   : > { %2391 = vmatprep.subr.bf16.mxu1 %v3790_v43  ;;  %v3803_v60 = vld [vmem:[%s4946_s3 + $0x40] ss:$8 sps:$4 sm:$0xff]  }
 0x73d   : > { %v2056_v62 = vcombine.low %v2032_v56, %v2048_v58  ;;  %v2057_v63 = vcombine.high %v2032_v56, %v2048_v58  ;;  %v2072_v0 = vcombine.low %v2039_v57, %v2055_v59  ;;  %v2073_v1 = vcombine.high %v2039_v57, %v2055_v59  ;;  %v3802_v57 = vld [vmem:[%s4940_s17 + $0x44] ss:$8 sps:$4 sm:$0xff]   ;;  %v3800_v59 = vld [vmem:[%s4940_s17 + $0x40] ss:$8 sps:$4 sm:$0xff]  }
 0x73e   : > { %v3805_v58 = vld [vmem:[%s4946_s3 + $0x44] ss:$8 sps:$4 sm:$0xff]  }
 0x73f   : > { %v2064_v2 = vrot.slane %v2056_v62, %v5029_v16  ;;  %v2071_v4 = vrot.slane %v2057_v63, %v5029_v16  ;;  %v2080_v5 = vrot.slane %v2072_v0, %v5029_v16  ;;  %v2087_v6 = vrot.slane %v2073_v1, %v5029_v16  ;;  %2392 = vmatpush1.bf16.msra.mxu1 %v3788_v45  ;;  %v3808_v62 = vld [vmem:[%s4940_s17 + $0x54] ss:$8 sps:$4 sm:$0xff]   ;;  %v3809_v63 = vld [vmem:[%s4946_s3 + $0x50] ss:$8 sps:$4 sm:$0xff]   ;;  %v3814_v1 = vld [vmem:[%s4940_s17 + $0x64] ss:$8 sps:$4 sm:$0xff]  }
 0x740   : > { %2393 = vmatprep.subr.bf16.mxu1 %v3796_v47  ;;  %v3811_v0 = vld [vmem:[%s4946_s3 + $0x54] ss:$8 sps:$4 sm:$0xff]  }
 0x741   : > { %v2092_v8 = vcombine.low %v2064_v2, %v2071_v4  ;;  %v3285_v9 = vcombine.high %v2064_v2, %v2071_v4  ;;  %v2108_v11 = vcombine.low %v2080_v5, %v2087_v6  ;;  %v3286_v12 = vcombine.high %v2080_v5, %v2087_v6  ;;  %v3817_v2 = vld [vmem:[%s4946_s3 + $0x64] ss:$8 sps:$4 sm:$0xff]   ;;  %v3812_v4 = vld [vmem:[%s4940_s17 + $0x60] ss:$8 sps:$4 sm:$0xff]   ;;  %v3820_v6 = vld [vmem:[%s4940_s17 + $0x74] ss:$8 sps:$4 sm:$0xff]  }
 0x742   : > { %v3815_v5 = vld [vmem:[%s4946_s3 + $0x60] ss:$8 sps:$4 sm:$0xff]  }
 0x743   : > { %v2099_v13 = vrot.slane %v2092_v8, %v5027_v10  ;;  %v2107_v15 = vrot.slane %v3285_v9, %v5027_v10  ;;  %v2115_v18 = vrot.slane %v2108_v11, %v5027_v10  ;;  %v2123_v19 = vrot.slane %v3286_v12, %v5027_v10  ;;  %2394 = vmatpush1.bf16.msra.mxu1 %v3794_v42  ;;  %v3818_v9 = vld [vmem:[%s4940_s17 + $0x70] ss:$8 sps:$4 sm:$0xff]  }
 0x744   : > { %2395 = vmatprep.subr.bf16.mxu1 %v3802_v57  ;;  %v4382_v8 = vmov 0   ;;  %v3821_v11 = vld [vmem:[%s4946_s3 + $0x70] ss:$8 sps:$4 sm:$0xff]  }
 0x745   : > { %v2125_v20 = vcombine.high %v2099_v13, %v2107_v15  ;;  %v2141_v21 = vcombine.high %v2115_v18, %v2123_v19  ;;  %v2124_v22 = vcombine.low %v2099_v13, %v2107_v15  ;;  %v2140_v14 = vcombine.low %v2115_v18, %v2123_v19  ;;  %2419 = vmatprep.mubr.bf16.mxu1 %v4382_v8 }
 0x747   : > { %v2139_v3 = vrot.slane %v2125_v20, %v5029_v16  ;;  %v2155_v17 = vrot.slane %v2141_v21, %v5029_v16  ;;  %v2132_v23 = vrot.slane %v2124_v22, %v5029_v16  ;;  %v2148_v24 = vrot.slane %v2140_v14, %v5029_v16  ;;  %2396 = vmatpush1.bf16.msra.mxu1 %v3800_v59  ;;  %v3824_v21 = vld [vmem:[%s4948_s21 + $0x40] sm:$0xff]   ;;  %v3826_v14 = vld [vmem:[%s4948_s21 + $0x48] sm:$0xff]  }
 0x748   : > { %2397 = vmatprep.subr.bf16.mxu1 %v3808_v62  ;;  %v3825_v22 = vld [vmem:[%s4948_s21] sm:$0xff]  }
 0x749   : > { %v2158_v26 = vcombine.low %v2139_v3, %v2155_v17  ;;  %v2157_v28 = vcombine.high %v2132_v23, %v2148_v24  ;;  %v2159_v29 = vcombine.high %v2139_v3, %v2155_v17  ;;  %v2156_v30 = vcombine.low %v2132_v23, %v2148_v24  ;;  %v3827_v3 = vld [vmem:[%s4948_s21 + $0x8] sm:$0xff]   ;;  %v3828_v17 = vld [vmem:[%s4948_s21 + $0x50] sm:$0xff]   ;;  %v3830_v24 = vld [vmem:[%s4948_s21 + $0x58] sm:$0xff]  }
 0x74a   : > { %v3829_v23 = vld [vmem:[%s4948_s21 + $0x10] sm:$0xff]  }
 0x74b   : > { %2165 = vrot.lane.b32.xlu1 %v2158_v26, %s4378_s18  ;;  %2161 = vrot.lane.b32.xlu0 %v2157_v28, %s4379_s15  ;;  %v3831_v26 = vld [vmem:[%s4948_s21 + $0x18] sm:$0xff]   ;;  %v3832_v28 = vld [vmem:[%s4948_s21 + $0x60] sm:$0xff]  }
 0x74c   : > { %2398 = vmatpush1.bf16.msra.mxu1 %v3806_v61 }
 0x74d   : > { %2399 = vmatprep.subr.bf16.mxu1 %v3814_v1  ;;  %v3871_v1 = vld [vmem:[#allocation11 + $0x48] sm:$0xff] (!%p3345_p12)  }
 0x74f   : > { %2169 = vrot.lane.b32.xlu1 %v2159_v29, %s4377_s22  ;;  %v3833_v29 = vld [vmem:[%s4948_s21 + $0x20] sm:$0xff]  }
 0x750   : > { %2400 = vmatpush1.bf16.msra.mxu1 %v3812_v4  ;;  %v3873_v4 = vld [vmem:[#allocation11 + $0x50] sm:$0xff] (!%p3345_p12)  }
 0x751   : > { %2401 = vmatprep.subr.bf16.mxu1 %v3820_v6  ;;  %v3875_v6 = vld [vmem:[#allocation11 + $0x58] sm:$0xff] (!%p3345_p12)  }
 0x754   : > { %2402 = vmatpush1.bf16.msra.mxu1 %v3818_v9  ;;  %v3879_v9 = vld [vmem:[#allocation11 + $0x68] sm:$0xff] (!%p3345_p12)  }
 0x755   : > { %3428 = vmatprep.subr.bf16.mxu1 %v3824_v21 }
 0x7bd   : > { %v2166_v10 = vpop.permute.xlu1 %2165  ;;  %v2162_v31 = vpop.permute.xlu0 %2161 }
 0x7be   : > { %v2172_v16 = vsel %vm1596_vm1, %v2156_v30, %v2162_v31  ;;  %v3834_v30 = vld [vmem:[%s4948_s21 + $0x68] sm:$0xff]   ;;  %v3836_v31 = vld [vmem:[%s4948_s21 + $0x70] sm:$0xff]  }
 0x7bf   : > { %v2174_v33 = vsel %vm2173_vm4, %v2172_v16, %v2166_v10  ;;  %v3835_v10 = vld [vmem:[%s4948_s21 + $0x28] sm:$0xff]   ;;  %v3837_v16 = vld [vmem:[%s4948_s21 + $0x30] sm:$0xff]  }
 0x7c1   : > { %v2170_v32 = vpop.permute.xlu1 %2169 }
 0x7c2   : > { %v2176_v34 = vsel %vm2175_vm5, %v2174_v33, %v2170_v32  ;;  %v3838_v32 = vld [vmem:[%s4948_s21 + $0x78] sm:$0xff]  }
 0x7c3   : > { %v2177_v25 = vpack.c.bf16 %v2176_v34, %v2176_v34  ;;  %v3839_v33 = vld [vmem:[%s4948_s21 + $0x38] sm:$0xff]  }
 0x7c5   : > { %3593 = vmatmul.mubr.bf16.vlgmr.msra.gmra.mrb[16].mxu0 %v2177_v25 }
 0x7c6   : > { %2525 = vmatpush1.bf16.msra.mxu0 %v3779_v27  ;;  %2556 = vmatprep.mubr.bf16.mxu0 %v4382_v8  ;;  %v3878_v8 = vld [vmem:[#allocation11 + $0x20] sm:$0xff] (!%p3345_p12)  }
 0x7c7   : > { %2526 = vmatprep.subr.bf16.mxu0 %v3787_v39 }
 0x7ca   : > { %2527 = vmatpush1.bf16.msra.mxu0 %v3785_v41 }
 0x7cb   : > { %2528 = vmatprep.subr.bf16.mxu0 %v3793_v44 }
 0x7ce   : > { %2529 = vmatpush1.bf16.msra.mxu0 %v3791_v46 }
 0x7cf   : > { %2530 = vmatprep.subr.bf16.mxu0 %v3799_v48 }
 0x7d2   : > { %2531 = vmatpush1.bf16.msra.mxu0 %v3797_v49 }
 0x7d3   : > { %2532 = vmatprep.subr.bf16.mxu0 %v3805_v58 }
 0x7d6   : > { %2533 = vmatpush1.bf16.msra.mxu0 %v3803_v60 }
 0x7d7   : > { %2534 = vmatprep.subr.bf16.mxu0 %v3811_v0  ;;  %v3870_v0 = vld [vmem:[#allocation11] sm:$0xff] (!%p3345_p12)  }
 0x7da   : > { %2535 = vmatpush1.bf16.msra.mxu0 %v3809_v63  ;;  %v3869_v63 = vld [vmem:[#allocation11 + $0x40] sm:$0xff] (!%p3345_p12)  }
 0x7db   : > { %2536 = vmatprep.subr.bf16.mxu0 %v3817_v2  ;;  %v3872_v2 = vld [vmem:[#allocation11 + $0x8] sm:$0xff] (!%p3345_p12)  }
 0x7de   : > { %2537 = vmatpush1.bf16.msra.mxu0 %v3815_v5  ;;  %v3874_v5 = vld [vmem:[#allocation11 + $0x10] sm:$0xff] (!%p3345_p12)  }
 0x7df   : > { %2538 = vmatprep.subr.bf16.mxu0 %v3823_v7  ;;  %v3877_v7 = vld [vmem:[#allocation11 + $0x60] sm:$0xff] (!%p3345_p12)  }
 0x7e2   : > { %2539 = vmatpush1.bf16.msra.mxu0 %v3821_v11  ;;  %v3880_v11 = vld [vmem:[#allocation11 + $0x28] sm:$0xff] (!%p3345_p12)  }
 0x7e3   : > { %3450 = vmatprep.subr.bf16.mxu0 (!%p3345_p12), %v3869_v63 }
 0x898   : > { %v2276_v50 = vpop.f32.mrb[16].mxu0 }
 0x899   : > { %v5199_v52 = vadd.f32 %v3868_v51, %v2276_v50  ;;  %v3594_v53 = vpop.f32.mrb[17].mxu0 }
 0x89a   : > { %v2279_v54 = vpop.f32.mrb[18].mxu0 }
 0x89b   : > { %v3595_v55 = vpop.f32.mrb[19].mxu0  ;;  %v2283_v56 = vmul.f32 %v5199_v52, %v5199_v52 }
 0x89d   : > { %2284 = vadd.xlane.f32.xlu0 %v2283_v56 }
 0x92a   : > { %v2285_v12 = vpop.xlane.xlu0 %2284 }
 0x92b   : > { %v2286_v13 = vmul.f32 0.0078125, %v2285_v12  ;;  %v3881_v12 = vld [vmem:[#allocation11 + $0x70] sm:$0xff] (!%p3345_p12)  }
 0x92d   : > { %v2287_v15 = vadd.f32 1e-06, %v2286_v13  ;;  %v3882_v13 = vld [vmem:[#allocation11 + $0x30] sm:$0xff] (!%p3345_p12)  }
 0x92f   : > { %3858 = vrsqrt.f32 %v2287_v15  ;;  %v3883_v15 = vld [vmem:[#allocation11 + $0x78] sm:$0xff] (!%p3345_p12)  }
 0x939   : > { %v3859_v18 = vpop.eup %3858 }
 0x93a   : > { %v2289_v19 = vmul.f32 %v3859_v18, %v5199_v52  ;;  %v3884_v18 = vld [vmem:[#allocation11 + $0x38] sm:$0xff] (!%p3345_p12)  }
 0x93c   : > { %v2290_v20 = vpack.c.bf16 %v2289_v19, %v2289_v19 }
 0x93e   : > { %2420 = vmatmul.mubr.bf16.vlgmr.msra.gmra.mrb[28].mxu1 %v2290_v20  ;;  %2557 = vmatmul.mubr.bf16.vlgmr.msra.gmra.mrb[20].mxu0 %v2290_v20 }
 0x93f   : > { %3429 = vmatpush3.bf16.msra.mxu1 %v3825_v22  ;;  %3451 = vmatpush3.bf16.xpose.msra.mxu0 (!%p3345_p12), %v3870_v0 }
 0x940   : > { %3430 = vmatprep.subr.bf16.mxu1 %v3826_v14  ;;  %3452 = vmatprep.subr.bf16.mxu0 (!%p3345_p12), %v3871_v1  ;;  %v3346_v14 = vld [vmem:[%s5406_s24] ss:$0 sm:$0xff] (!%p3345_p12) }
 0x943   : > { %3431 = vmatpush3.bf16.msra.mxu1 %v3827_v3 }
 0x944   : > { %3432 = vmatprep.subr.bf16.mxu1 %v3828_v17 }
 0x947   : > { %3433 = vmatpush3.bf16.msra.mxu1 %v3829_v23  ;;  %3453 = vmatpush3.bf16.xpose.msra.mxu0 (!%p3345_p12), %v3872_v2 }
 0x948   : > { %3434 = vmatprep.subr.bf16.mxu1 %v3830_v24  ;;  %3454 = vmatprep.subr.bf16.mxu0 (!%p3345_p12), %v3873_v4 }
 0x94b   : > { %3435 = vmatpush3.bf16.msra.mxu1 %v3831_v26 }
 0x94c   : > { %3436 = vmatprep.subr.bf16.mxu1 %v3832_v28 }
 0x94f   : > { %3437 = vmatpush3.bf16.msra.mxu1 %v3833_v29  ;;  %3455 = vmatpush3.bf16.xpose.msra.mxu0 (!%p3345_p12), %v3874_v5 }
 0x950   : > { %3438 = vmatprep.subr.bf16.mxu1 %v3834_v30  ;;  %3456 = vmatprep.subr.bf16.mxu0 (!%p3345_p12), %v3875_v6 }
 0x953   : > { %3439 = vmatpush3.bf16.msra.mxu1 %v3835_v10 }
 0x954   : > { %3440 = vmatprep.subr.bf16.mxu1 %v3836_v31 }
 0x957   : > { %3441 = vmatpush3.bf16.msra.mxu1 %v3837_v16 }
 0x958   : > { %3442 = vmatprep.subr.bf16.mxu1 %v3838_v32 }
 0x95b   : > { %3443 = vmatpush3.bf16.msra.mxu1 %v3839_v33 }
 0xa11   : > { %v2421_v34 = vpop.f32.mrb[28].mxu1  ;;  %v2558_v25 = vpop.f32.mrb[20].mxu0 }
 0xa12   : > { %v3327_v35 = vmul.f32 -1.442695, %v2421_v34  ;;  %v2423_v36 = vpop.f32.mrb[29].mxu1  ;;  %v2560_v27 = vpop.f32.mrb[21].mxu0 }
 0xa13   : > { %v3328_v37 = vmul.f32 -1.442695, %v2423_v36  ;;  %v2425_v38 = vpop.f32.mrb[30].mxu1  ;;  %v2562_v39 = vpop.f32.mrb[22].mxu0 }
 0xa14   : > { %3860 = vpow2.f32 %v3327_v35  ;;  %v2426_v40 = vpop.f32.mrb[31].mxu1  ;;  %v2563_v41 = vpop.f32.mrb[23].mxu0 }
 0xa15   : > { %3862 = vpow2.f32 %v3328_v37 }
 0xa1e   : > { %v3861_v43 = vpop.eup %3860 }
 0xa1f   : > { %v3863_v44 = vpop.eup %3862  ;;  %v2571_v45 = vadd.f32 1.0, %v3861_v43 }
 0xa20   : > { %v2572_v46 = vadd.f32 1.0, %v3863_v44 }
 0xa21   : > { %3864 = vrcp.f32 %v2571_v45 }
 0xa22   : > { %3866 = vrcp.f32 %v2572_v46 }
 0xa2b   : > { %v3865_v47 = vpop.eup %3864 }
 0xa2c   : > { %v3867_v48 = vpop.eup %3866  ;;  %v2577_v42 = vmul.f32 %v3865_v47, %v2421_v34 }
 0xa2d   : > { %v2578_v49 = vmul.f32 %v3867_v48, %v2423_v36 }
 0xa2e   : > { %v2579_v50 = vmul.f32 %v2577_v42, %v2558_v25 }
 0xa2f   : > { %v2580_v51 = vmul.f32 %v2578_v49, %v2560_v27 }
 0xa30   : > { %v2581_v54 = vpack.c.bf16 %v2579_v50, %v2579_v50 }
 0xa31   : > { %v2582_v53 = vpack.c.bf16 %v2580_v51, %v2580_v51 }
 0xa33   : > { %2743 = vmatprep.mubr.bf16.mxu1 %v2582_v53 }
 0xa34   : > { %2744 = vmatmul.mubr.bf16.vlgmr.msra.gmra.mrb[32].mxu1 %v2581_v54 }
 0xb07   : > { %v3444_v55 = vpop.f32.mrb[32].mxu1  ;;  %2756 = sbr.rel (%p3345_p12) target bundleno = 3218 (0xc92), region = 132 }
 0xb08   : > { %v3445_v56 = vpop.f32.mrb[33].mxu1 }
 0xb09   : > { %v3446_v57 = vadd.f32 %v3445_v56, %v3444_v55  ;;  %v3447_v58 = vpop.f32.mrb[34].mxu1 }
 0xb0a   : > { %v3448_v59 = vpop.f32.mrb[35].mxu1 }
 0xb0b   : > { %v2751_v60 = vadd.f32 %v3446_v57, %v5199_v52  ;;  %v3876_v52 = vld [vmem:[#allocation11 + $0x18] sm:$0xff] (!%p3345_p12)  }
 0xb0c   : > { %3457 = vmatpush3.bf16.xpose.msra.mxu0 (!%p3345_p12), %v3876_v52 }
 0xb0d   : > { %2752 = vst [vmem:[#allocation2] sm:$0xff] %v2751_v60  ;;  %3458 = vmatprep.subr.bf16.mxu0 (!%p3345_p12), %v3877_v7 }
 0xb14   : > { %v2757_v61 = vld [vmem:[#allocation2] sm:$0xff]  ;;  %3459 = vmatpush3.bf16.xpose.msra.mxu0 %v3878_v8 }
 0xb15   : > { %v2758_v62 = vmul.f32 %v2757_v61, %v2757_v61  ;;  %3460 = vmatprep.subr.bf16.mxu0 %v3879_v9 }
 0xb17   : > { %2759 = vadd.xlane.f32.xlu0 %v2758_v62 }
 0xb1c   : > { %3461 = vmatpush3.bf16.xpose.msra.mxu0 %v3880_v11 }
 0xb1d   : > { %3462 = vmatprep.subr.bf16.mxu0 %v3881_v12 }
 0xb24   : > { %3463 = vmatpush3.bf16.xpose.msra.mxu0 %v3882_v13 }
 0xb25   : > { %3464 = vmatprep.subr.bf16.mxu0 %v3883_v15 }
 0xb2c   : > { %3465 = vmatpush3.bf16.xpose.msra.mxu0 %v3884_v18 }
 0xba4   : > { %v2760_v19 = vpop.xlane.xlu0 %2759 }
 0xba5   : > { %v2761_v20 = vmul.f32 0.0078125, %v2760_v19 }
 0xba7   : > { %v2762_v21 = vadd.f32 1e-06, %v2761_v20 }
 0xba9   : > { %3885 = vrsqrt.f32 %v2762_v21 }
 0xbb3   : > { %v3886_v22 = vpop.eup %3885 }
 0xbb4   : > { %v2764_v3 = vmul.f32 %v3886_v22, %v2757_v61 }
 0xbb6   : > { %v2772_v17 = vmul.f32 %v3346_v14, %v2764_v3 }
 0xbb8   : > { %2773 = vst [vmem:[#allocation23] sm:$0xff] %v2772_v17  ;;  %v2774_v23 = vpack.c.bf16 %v2772_v17, %v2772_v17 }
 0xbba   : > { %3466 = vmatprep.mubr.bf16.mxu0 %v2774_v23 }
 0xbbb   : > { %3467 = vmatmul.mubr.bf16.vlgmr.msra.gmra.mrb[0].mxu0 %v2774_v23 }
 0xc8e   : > { %v2937_v24 = vpop.f32.mrb[0].mxu0 }
 0xc8f   : > { %2944 = vst [vmem:[#allocation24] sm:$0xff] %v2937_v24  ;;  %v2939_v26 = vpop.f32.mrb[1].mxu0 }
 0xc90   : > { %2945 = vst [vmem:[#allocation24 + $0x8] sm:$0xff] %v2939_v26  ;;  %v2941_v28 = vpop.f32.mrb[2].mxu0 }
 0xc91   : > { %v2942_v29 = vpop.f32.mrb[3].mxu0 }
 0xc92 PF: > { %s5407_s30 = sld [smem:[#allocation37_spill]]  ;;  %s4383_s13 = smov [#allocation23]  }
 0xc93   : > { %s2953_s29 = sshll.u32 %s4383_s13, 4  ;;  %s4384_s4 = smov [#allocation24]   ;;  %s2954_s29 = int_to_ptr.vmem [resolvable:$true] %s2953_s29 }
 0xc94   : > { %s2964_s5 = sshll.u32 %s4384_s4, 4  ;;  %s4237_s25 = scalar_lea.vmem %s2954_s29, 128  ;;  %s2965_s5 = int_to_ptr.vmem [resolvable:$true] %s2964_s5 }
 0xc95   : > { %p4238_p0 = scmp.ne.s32.totalorder %s2954_s29, %s4237_s25  ;;  %p4244_p13 = scmp.lt.s32.totalorder %s2954_s29, %s2954_s29 }
 0xc96   : > { %p4245_p3 = scmp.lt.s32.totalorder %s4237_s25, %s4237_s25 }
 0xc98   : > { %p3687_p1 = scmp.eq.s32.totalorder %s5407_s30, 1  ;;  %p4246_p6 = por %p4245_p3, %p4244_p13 }
 0xc9a   : > { %p4239_p4 = pnand %p4238_p0, %p3687_p1 }
 0xc9c   : > { %p4240_p8 = pneg %p4239_p4 }
 0xc9e   : > { %p4247_p9 = pnand %p4246_p6, %p4240_p8 }
 0xca0   : > { %4250 = shalt.err (!%p4247_p9)
}
 0xca1   : > { %s5408_s3 = sld [smem:[#allocation51_spill]] }
 0xca7   : > { %s4251_s7 = scalar_lea.hbm %s5408_s3, 128 }
 0xca8   : > { %p4252_p11 = scmp.ne.s32.totalorder %s5408_s3, %s4251_s7  ;;  %p4257_p2 = scmp.lt.u32.totalorder %s4251_s7, %s5408_s3 }
 0xcaa   : > { %p4253_p10 = pnand %p4252_p11, %p3687_p1 }
 0xcac   : > { %p4254_p7 = pneg %p4253_p10 }
 0xcae   : > { %p4259_p5 = pnand %p4257_p2, %p4254_p7 }
 0xcb0   : > { %4262 = shalt.err (!%p4259_p5)
}
 0xcb1   : > { %3631 = dma.vmem_to_hbm [thread:$0]  (%p3687_p1), %s2954_s29, 128, %s5408_s3, [#allocation5]  }
 0xcb2   : > { %s4263_s22 = scalar_lea.vmem %s2965_s5, 256  ;;  %p4270_p8 = scmp.lt.s32.totalorder %s2965_s5, %s2965_s5 }
 0xcb3   : > { %p4264_p12 = scmp.ne.s32.totalorder %s2965_s5, %s4263_s22  ;;  %p4271_p13 = scmp.lt.s32.totalorder %s4263_s22, %s4263_s22 }
 0xcb5   : > { %p4265_p0 = pnand %p4264_p12, %p3687_p1  ;;  %p4272_p3 = por %p4271_p13, %p4270_p8 }
 0xcb7   : > { %p4266_p4 = pneg %p4265_p0 }
 0xcb9   : > { %p4273_p6 = pnand %p4272_p3, %p4266_p4 }
 0xcbb   : > { %4276 = shalt.err (!%p4273_p6)
}
 0xcbc   : > { %s5409_s19 = sld [smem:[#allocation52_spill]] }
 0xcc2   : > { %s5410_s9 = smov %s5409_s19  ;;  %s4277_s23 = scalar_lea.hbm %s5409_s19, 256 }
 0xcc3   : > { %p4278_p9 = scmp.ne.s32.totalorder %s5410_s9, %s4277_s23  ;;  %p4283_p7 = scmp.lt.u32.totalorder %s4277_s23, %s5410_s9 }
 0xcc5   : > { %p4279_p11 = pnand %p4278_p9, %p3687_p1 }
 0xcc7   : > { %p4280_p10 = pneg %p4279_p11 }
 0xcc9   : > { %p4285_p2 = pnand %p4283_p7, %p4280_p10 }
 0xccb   : > { %4288 = shalt.err (!%p4285_p2)
}
 0xccc   : > { %3633 = dma.vmem_to_hbm [thread:$0]  (%p3687_p1), %s2965_s5, 256, %s5410_s9, [#allocation25]  }
 0xccd   : > { %4334 = dma.done.wait (%p3687_p1), [#allocation5], 128  }
 0xcce   : > { %4336 = vsyncadd (%p3687_p1), [#allocation5], 4294967168 }
 0xccf   : > { %4338 = dma.done.wait (%p3687_p1), [#allocation25], 256  }
 0xcd0   : > { %4340 = vsyncadd (%p3687_p1), [#allocation25], 4294967040 }
 0xcd1 PF: > { %s5411_s21 = sld [smem:[#allocation40_spill]]  ;;  %s5412_s18 = sld [smem:[#allocation35_spill]] }
 0xcd2   : > { %s5413_s19 = sld [smem:[#allocation36_spill]]  ;;  %s5414_s20 = sld [smem:[#allocation41_spill]] }
 0xcd7   : > { %p40_p5 = scmp.ge.s32.totalorder %s5411_s21, 4  }
 0xcd9   :  { %42 = sbr.rel (!%p40_p5) target bundleno = 26 (0x1a), region = 222 }
 0xce0   :  { %2981 = vsyncpa [#allocation4], 1 }
 0xce1   :  { %2983 = vsyncpa [#allocation4 + $0x1], 1 }
 0xce2   :  { %2984 = vsyncpa [#allocation7], 1 }
 0xce3   :  { %2985 = vsyncpa [#allocation10], 1 }
 0xce4   :  { %2986 = vsyncpa [#allocation13], 1 }
 0xce5   :  { %2988 = vsyncpa [#allocation13 + $0x1], 1 }
 0xce6   :  { %2989 = vsyncpa [#allocation16], 1 }
 0xce7   :  { %2991 = vsyncpa [#allocation16 + $0x1], 1 }
 0xce8   :  { %2992 = vsyncpa [#allocation19], 1 }
 0xce9   :  { %2994 = vsyncpa [#allocation19 + $0x1], 1 }
 0xcea   :  { %2995 = vsyncpa [#allocation22], 1 }
 0xceb   :  { %2997 = vsyncpa [#allocation22 + $0x1], 1 }
 0xcec   :  { %2998 = vsyncpa [#allocation5], 1 }
 0xced   :  { %3000 = vsyncpa [#allocation5 + $0x1], 1 }
 0xcee   :  { %3001 = vsyncpa [#allocation25], 1 }

</bundles_post_ra>
